<compile_context>
chip_gen: v7x
topology: tpu7x:2x2x1
jax: 0.10.0
libtpu: 0.0.40
codegen_flags: <defaults>
</compile_context>

<pallas_src>
import jax
import jax.numpy as jnp
from jax.experimental import pallas as pl
from jax.experimental.pallas import tpu as pltpu

FEAT_C = 2560     # efficientnet-b7 feature channels (b4=1792, b2=1408)
CSV_HID = 250
CSV_PAD = 256     # csv hidden dim padded to lane width multiple
BN_EPS = 1e-5
OUT_LANE = 128    # pad classifier output to lane width


def _round_up(x, m):
    return (x + m - 1) // m * m


def efficient_head_kernel(
    csv_ref,                         # (tb, no_columns)              f32
    feat_ref,                        # (tb, ts, FEAT_C)              f32 (channels on lanes)
    w1_ref, b1_ref,                  # (no_columns, CSV_PAD), (1, CSV_PAD)  BN1 folded in
    w2_ref, b2_ref,                  # (CSV_PAD, CSV_PAD),    (1, CSV_PAD)  BN2 folded in
    wc_img_ref,                      # (FEAT_C, out_pad)  (1/HW folded in)
    wc_csv_ref,                      # (CSV_PAD, out_pad)
    bc_ref,                          # (1, out_pad)
    out_ref,                         # (tb, out_pad)
    acc_ref,                         # scratch: (tb, FEAT_C) f32 pooled-sum accumulator
    csvacc_ref,                      # scratch: (tb, out_pad) f32 csv-branch + bias contribution
):
    s = pl.program_id(1)

    @pl.when(s == 0)
    def _init():
        acc_ref[...] = jnp.zeros_like(acc_ref)
        # csv branch: (Linear + BN1d(eval) + ReLU + Dropout(eval=id)) x 2, then
        # its classifier contribution + bias.  BN folded into w/b in wrapper.
        # Done at the first spatial step so it hides under the streaming DMA
        # and the last step's critical path is just one matmul + store.
        h = jnp.dot(csv_ref[...], w1_ref[...],
                    preferred_element_type=jnp.float32) + b1_ref[...]
        h = jnp.maximum(h, 0.0)
        h = jnp.dot(h, w2_ref[...],
                    preferred_element_type=jnp.float32) + b2_ref[...]
        h = jnp.maximum(h, 0.0)
        csvacc_ref[...] = (jnp.dot(h, wc_csv_ref[...],
                                   preferred_element_type=jnp.float32)
                           + bc_ref[...])

    # Streamed global avg-pool: accumulate the spatial (sublane) sum, channels
    # stay lane-dense.  Divisor 1/HW is folded into wc_img.
    acc_ref[...] += jnp.sum(feat_ref[...], axis=1)

    @pl.when(s == pl.num_programs(1) - 1)
    def _finalize():
        out = (jnp.dot(acc_ref[...], wc_img_ref[...],
                       preferred_element_type=jnp.float32)
               + csvacc_ref[...])
        out_ref[...] = out.astype(out_ref.dtype)


def efficient_network_forward(feature_map, csv_data, params):
    """feature_map: (B, FEAT_C, H, W) NCHW backbone output; csv_data: (B, no_columns)."""
    B, C, H, W = feature_map.shape
    assert C == FEAT_C
    HW = H * W
    NC = csv_data.shape[1]
    out_size = params["bc"].shape[-1]

    # ---- inference-time constant folding (f32, in the wrapper) -------------
    s1 = params["g1"] * jax.lax.rsqrt(params["rv1"] + BN_EPS)
    w1f = params["w1"] * s1
    b1f = (params["b1"] - params["rm1"]) * s1 + params["beta1"]
    s2 = params["g2"] * jax.lax.rsqrt(params["rv2"] + BN_EPS)
    w2f = params["w2"] * s2
    b2f = (params["b2"] - params["rm2"]) * s2 + params["beta2"]

    out_pad = _round_up(out_size, OUT_LANE)
    hpad = CSV_PAD - CSV_HID

    # Pad csv hidden dim to 256 (zeros keep the math exact: padded hidden
    # activations are exactly 0, padded wc_csv rows are 0).
    w1p = jnp.pad(w1f, ((0, 0), (0, hpad)))
    b1p = jnp.pad(b1f, ((0, 0), (0, hpad)))
    w2p = jnp.pad(w2f, ((0, hpad), (0, hpad)))
    b2p = jnp.pad(b2f, ((0, 0), (0, hpad)))

    def pad_out(a):
        return jnp.pad(a, ((0, 0), (0, out_pad - out_size)))

    wc_img = pad_out(params["wc_img"]) * (1.0 / HW)          # fold pool divisor
    wc_csv = jnp.pad(pad_out(params["wc_csv"]), ((0, hpad), (0, 0)))
    bc = pad_out(params["bc"])

    # ---- channels-on-lanes layout + batch/spatial padding -------------------
    feat = feature_map.reshape(B, C, HW).transpose(0, 2, 1).astype(jnp.float32)  # (B, HW, C)
    csv = csv_data.astype(jnp.float32)

    tb = B if B < 8 else 8                       # batch rows per grid step
    b_pad = _round_up(B, tb)
    ts = 64                                      # spatial rows per grid step (~5 MB DMA tile)
    if HW < ts:
        ts = _round_up(HW, 8)
    hw_pad = _round_up(HW, ts)                   # zero rows do not change the sum

    feat = jnp.pad(feat, ((0, b_pad - B), (0, hw_pad - HW), (0, 0)))
    csv = jnp.pad(csv, ((0, b_pad - B), (0, 0)))

    grid = (b_pad // tb, hw_pad // ts)           # reduction (spatial) axis last

    out = pl.pallas_call(
        efficient_head_kernel,
        out_shape=jax.ShapeDtypeStruct((b_pad, out_pad), jnp.float32),
        grid_spec=pltpu.PrefetchScalarGridSpec(
            num_scalar_prefetch=0,
            grid=grid,
            in_specs=[
                pl.BlockSpec((tb, NC), lambda b, s: (b, 0)),
                pl.BlockSpec((tb, ts, FEAT_C), lambda b, s: (b, s, 0)),
                pl.BlockSpec((NC, CSV_PAD), lambda b, s: (0, 0)),
                pl.BlockSpec((1, CSV_PAD), lambda b, s: (0, 0)),
                pl.BlockSpec((CSV_PAD, CSV_PAD), lambda b, s: (0, 0)),
                pl.BlockSpec((1, CSV_PAD), lambda b, s: (0, 0)),
                pl.BlockSpec((FEAT_C, out_pad), lambda b, s: (0, 0)),
                pl.BlockSpec((CSV_PAD, out_pad), lambda b, s: (0, 0)),
                pl.BlockSpec((1, out_pad), lambda b, s: (0, 0)),
            ],
            out_specs=pl.BlockSpec((tb, out_pad), lambda b, s: (b, 0)),
            scratch_shapes=[
                pltpu.VMEM((tb, FEAT_C), jnp.float32),
                pltpu.VMEM((tb, out_pad), jnp.float32),
            ],
        ),
        compiler_params=pltpu.CompilerParams(
            dimension_semantics=("parallel", "arbitrary"),
            vmem_limit_bytes=32 * 1024 * 1024,
        ),
    )(csv, feat, w1p, b1p, w2p, b2p, wc_img, wc_csv, bc)

    return out[:B, :out_size]


def init_params(key, no_columns, output_size, feat_c=FEAT_C, hid=CSV_HID):
    """Deterministic synthetic parameters matching the module's shapes."""
    ks = jax.random.split(key, 12)

    def linear(k, fan_in, fan_out):
        kw, kb = jax.random.split(k)
        bound = 1.0 / (fan_in ** 0.5)
        w = jax.random.uniform(kw, (fan_in, fan_out), jnp.float32, -bound, bound)
        b = jax.random.uniform(kb, (1, fan_out), jnp.float32, -bound, bound)
        return w, b

    w1, b1 = linear(ks[0], no_columns, hid)
    w2, b2 = linear(ks[1], hid, hid)
    wc, bc = linear(ks[2], feat_c + hid, output_size)

    def bn(kg, kb, km, kv, n):
        return dict(
            g=1.0 + 0.1 * jax.random.normal(kg, (1, n), jnp.float32),
            beta=0.1 * jax.random.normal(kb, (1, n), jnp.float32),
            rm=0.1 * jax.random.normal(km, (1, n), jnp.float32),
            rv=jax.random.uniform(kv, (1, n), jnp.float32, 0.5, 1.5),
        )

    bn1 = bn(ks[3], ks[4], ks[5], ks[6], hid)
    bn2 = bn(ks[7], ks[8], ks[9], ks[10], hid)

    return dict(
        w1=w1, b1=b1, g1=bn1["g"], beta1=bn1["beta"], rm1=bn1["rm"], rv1=bn1["rv"],
        w2=w2, b2=b2, g2=bn2["g"], beta2=bn2["beta"], rm2=bn2["rm"], rv2=bn2["rv"],
        wc_img=wc[:feat_c, :], wc_csv=wc[feat_c:, :], bc=bc,
    )


def reference_forward(feature_map, csv_data, p):
    """Pure-JAX reference of the same (eval-mode) forward."""
    pooled = feature_map.mean(axis=(2, 3))
    h = csv_data @ p["w1"] + p["b1"]
    h = (h - p["rm1"]) * p["g1"] / jnp.sqrt(p["rv1"] + BN_EPS) + p["beta1"]
    h = jnp.maximum(h, 0.0)
    h = h @ p["w2"] + p["b2"]
    h = (h - p["rm2"]) * p["g2"] / jnp.sqrt(p["rv2"] + BN_EPS) + p["beta2"]
    h = jnp.maximum(h, 0.0)
    cat = jnp.concatenate([pooled, h], axis=1)
    wc = jnp.concatenate([p["wc_img"], p["wc_csv"]], axis=0)
    return cat @ wc + p["bc"]


if __name__ == "__main__":
    B, NO_COLUMNS, OUTPUT_SIZE = 2, 4, 8
    Hf = Wf = 4   # backbone output spatial size

    key = jax.random.PRNGKey(0)
    k_feat, k_csv, k_params = jax.random.split(key, 3)

    # Synthetic backbone output (stand-in for EfficientNet-b7 extract_features) + csv input.
    feature_map = jax.random.normal(k_feat, (B, FEAT_C, Hf, Wf), jnp.float32)
    csv_data = jax.random.normal(k_csv, (B, NO_COLUMNS), jnp.float32)
    params = init_params(k_params, NO_COLUMNS, OUTPUT_SIZE)

    out = efficient_network_forward(feature_map, csv_data, params)
    out = jax.block_until_ready(out)

    ref = reference_forward(feature_map, csv_data, params)
    assert out.shape == (B, OUTPUT_SIZE)
    assert jnp.allclose(out, ref, atol=1e-3, rtol=1e-3), "kernel vs reference mismatch"

    print("KERNEL_OK")
</pallas_src>

<mosaic_0001>
module attributes {stable_mosaic.version = 11 : i64} {
  func.func @efficient_head_kernel(%arg0: i32, %arg1: i32, %arg2: memref<2x4xf32, #tpu.memory_space<vmem>>, %arg3: memref<2x16x2560xf32, #tpu.memory_space<vmem>>, %arg4: memref<4x256xf32, #tpu.memory_space<vmem>>, %arg5: memref<1x256xf32, #tpu.memory_space<vmem>>, %arg6: memref<256x256xf32, #tpu.memory_space<vmem>>, %arg7: memref<1x256xf32, #tpu.memory_space<vmem>>, %arg8: memref<2560x128xf32, #tpu.memory_space<vmem>>, %arg9: memref<256x128xf32, #tpu.memory_space<vmem>>, %arg10: memref<1x128xf32, #tpu.memory_space<vmem>>, %arg11: memref<2x128xf32, #tpu.memory_space<vmem>>, %arg12: memref<2x2560xf32, #tpu.memory_space<vmem>>, %arg13: memref<2x128xf32, #tpu.memory_space<vmem>>) attributes {dimension_semantics = [#tpu.dimension_semantics<parallel>, #tpu.dimension_semantics<arbitrary>], iteration_bounds = array<i64: 1, 1>, scalar_prefetch = 0 : i64, scratch_operands = 2 : i64, tpu.core_type = #tpu.core_type<tc>, window_params = [{transform_indices = @transform_0, window_bounds = array<i64: 2, 4>}, {transform_indices = @transform_1, window_bounds = array<i64: 2, 16, 2560>}, {pipeline_mode = #tpu.pipeline_mode<synchronous>, transform_indices = @transform_2, window_bounds = array<i64: 4, 256>}, {pipeline_mode = #tpu.pipeline_mode<synchronous>, transform_indices = @transform_3, window_bounds = array<i64: 1, 256>}, {pipeline_mode = #tpu.pipeline_mode<synchronous>, transform_indices = @transform_4, window_bounds = array<i64: 256, 256>}, {pipeline_mode = #tpu.pipeline_mode<synchronous>, transform_indices = @transform_5, window_bounds = array<i64: 1, 256>}, {pipeline_mode = #tpu.pipeline_mode<synchronous>, transform_indices = @transform_6, window_bounds = array<i64: 2560, 128>}, {pipeline_mode = #tpu.pipeline_mode<synchronous>, transform_indices = @transform_7, window_bounds = array<i64: 256, 128>}, {pipeline_mode = #tpu.pipeline_mode<synchronous>, transform_indices = @transform_8, window_bounds = array<i64: 1, 128>}, {transform_indices = @transform_9, window_bounds = array<i64: 2, 128>}]} {
    %c0_i32 = arith.constant 0 : i32
    %0 = arith.cmpi eq, %arg1, %c0_i32 : i32
    %1 = arith.extui %0 : i1 to i32
    %c0_i32_0 = arith.constant 0 : i32
    %2 = arith.cmpi ne, %1, %c0_i32_0 : i32
    scf.if %2 {
      %cst_9 = arith.constant 0.000000e+00 : f32
      %11 = vector.broadcast %cst_9 : f32 to vector<2x2560xf32>
      %c0_10 = arith.constant 0 : index
      %c0_11 = arith.constant 0 : index
      %12 = vector.load %arg12[%c0_10, %c0_11] : memref<2x2560xf32, #tpu.memory_space<vmem>>, vector<2x2560xf32>
      tpu.vector_store %arg12[%c0_10, %c0_11], %11 {strides = array<i32>} : memref<2x2560xf32, #tpu.memory_space<vmem>>, vector<2x2560xf32>,
      %c0_12 = arith.constant 0 : index
      %c0_13 = arith.constant 0 : index
      %13 = vector.load %arg2[%c0_12, %c0_13] : memref<2x4xf32, #tpu.memory_space<vmem>>, vector<2x4xf32>
      %c0_14 = arith.constant 0 : index
      %c0_15 = arith.constant 0 : index
      %14 = vector.load %arg4[%c0_14, %c0_15] : memref<4x256xf32, #tpu.memory_space<vmem>>, vector<4x256xf32>
      %cst_16 = arith.constant dense<0.000000e+00> : vector<2x256xf32>
      %15 = tpu.matmul %13, %14, %cst_16 {dimension_numbers = #tpu.dot_dimension_numbers<[1], [0], [0], [1], [0, 0, 1, 1], [], []>} : vector<2x4xf32>, vector<4x256xf32>, vector<2x256xf32> -> vector<2x256xf32>
      %c0_17 = arith.constant 0 : index
      %c0_18 = arith.constant 0 : index
      %16 = vector.load %arg5[%c0_17, %c0_18] : memref<1x256xf32, #tpu.memory_space<vmem>>, vector<1x256xf32>
      %17 = vector.broadcast %16 : vector<1x256xf32> to vector<2x256xf32>
      %18 = arith.addf %15, %17 : vector<2x256xf32>
      %cst_19 = arith.constant 0.000000e+00 : f32
      %19 = vector.broadcast %cst_19 : f32 to vector<2x256xf32>
      %20 = arith.maximumf %18, %19 : vector<2x256xf32>
      %c0_20 = arith.constant 0 : index
      %c0_21 = arith.constant 0 : index
      %21 = vector.load %arg6[%c0_20, %c0_21] : memref<256x256xf32, #tpu.memory_space<vmem>>, vector<256x256xf32>
      %cst_22 = arith.constant dense<0.000000e+00> : vector<2x256xf32>
      %22 = tpu.matmul %20, %21, %cst_22 {dimension_numbers = #tpu.dot_dimension_numbers<[1], [0], [0], [1], [0, 0, 1, 1], [], []>} : vector<2x256xf32>, vector<256x256xf32>, vector<2x256xf32> -> vector<2x256xf32>
      %c0_23 = arith.constant 0 : index
      %c0_24 = arith.constant 0 : index
      %23 = vector.load %arg7[%c0_23, %c0_24] : memref<1x256xf32, #tpu.memory_space<vmem>>, vector<1x256xf32>
      %24 = vector.broadcast %23 : vector<1x256xf32> to vector<2x256xf32>
      %25 = arith.addf %22, %24 : vector<2x256xf32>
      %cst_25 = arith.constant 0.000000e+00 : f32
      %26 = vector.broadcast %cst_25 : f32 to vector<2x256xf32>
      %27 = arith.maximumf %25, %26 : vector<2x256xf32>
      %c0_26 = arith.constant 0 : index
      %c0_27 = arith.constant 0 : index
      %28 = vector.load %arg9[%c0_26, %c0_27] : memref<256x128xf32, #tpu.memory_space<vmem>>, vector<256x128xf32>
      %cst_28 = arith.constant dense<0.000000e+00> : vector<2x128xf32>
      %29 = tpu.matmul %27, %28, %cst_28 {dimension_numbers = #tpu.dot_dimension_numbers<[1], [0], [0], [1], [0, 0, 1, 1], [], []>} : vector<2x256xf32>, vector<256x128xf32>, vector<2x128xf32> -> vector<2x128xf32>
      %c0_29 = arith.constant 0 : index
      %c0_30 = arith.constant 0 : index
      %30 = vector.load %arg10[%c0_29, %c0_30] : memref<1x128xf32, #tpu.memory_space<vmem>>, vector<1x128xf32>
      %31 = vector.broadcast %30 : vector<1x128xf32> to vector<2x128xf32>
      %32 = arith.addf %29, %31 : vector<2x128xf32>
      %c0_31 = arith.constant 0 : index
      %c0_32 = arith.constant 0 : index
      %33 = vector.load %arg13[%c0_31, %c0_32] : memref<2x128xf32, #tpu.memory_space<vmem>>, vector<2x128xf32>
      tpu.vector_store %arg13[%c0_31, %c0_32], %32 {strides = array<i32>} : memref<2x128xf32, #tpu.memory_space<vmem>>, vector<2x128xf32>,
    } else {
    }
    %c0 = arith.constant 0 : index
    %c0_1 = arith.constant 0 : index
    %3 = vector.load %arg12[%c0, %c0_1] : memref<2x2560xf32, #tpu.memory_space<vmem>>, vector<2x2560xf32>
    %c0_2 = arith.constant 0 : index
    %c0_3 = arith.constant 0 : index
    %c0_4 = arith.constant 0 : index
    %4 = vector.load %arg3[%c0_2, %c0_3, %c0_4] : memref<2x16x2560xf32, #tpu.memory_space<vmem>>, vector<2x16x2560xf32>
    %cst = arith.constant dense<0.000000e+00> : vector<2x2560xf32>
    %5 = vector.multi_reduction <add>, %4, %cst [1] : vector<2x16x2560xf32> to vector<2x2560xf32>
    %6 = arith.addf %3, %5 : vector<2x2560xf32>
    %c0_5 = arith.constant 0 : index
    %c0_6 = arith.constant 0 : index
    %7 = vector.load %arg12[%c0_5, %c0_6] : memref<2x2560xf32, #tpu.memory_space<vmem>>, vector<2x2560xf32>
    tpu.vector_store %arg12[%c0_5, %c0_6], %6 {strides = array<i32>} : memref<2x2560xf32, #tpu.memory_space<vmem>>, vector<2x2560xf32>,
    %c0_i32_7 = arith.constant 0 : i32
    %8 = arith.cmpi eq, %arg1, %c0_i32_7 : i32
    %9 = arith.extui %8 : i1 to i32
    %c0_i32_8 = arith.constant 0 : i32
    %10 = arith.cmpi ne, %9, %c0_i32_8 : i32
    scf.if %10 {
      %c0_9 = arith.constant 0 : index
      %c0_10 = arith.constant 0 : index
      %11 = vector.load %arg12[%c0_9, %c0_10] : memref<2x2560xf32, #tpu.memory_space<vmem>>, vector<2x2560xf32>
      %c0_11 = arith.constant 0 : index
      %c0_12 = arith.constant 0 : index
      %12 = vector.load %arg8[%c0_11, %c0_12] : memref<2560x128xf32, #tpu.memory_space<vmem>>, vector<2560x128xf32>
      %cst_13 = arith.constant dense<0.000000e+00> : vector<2x128xf32>
      %13 = tpu.matmul %11, %12, %cst_13 {dimension_numbers = #tpu.dot_dimension_numbers<[1], [0], [0], [1], [0, 0, 1, 1], [], []>} : vector<2x2560xf32>, vector<2560x128xf32>, vector<2x128xf32> -> vector<2x128xf32>
      %c0_14 = arith.constant 0 : index
      %c0_15 = arith.constant 0 : index
      %14 = vector.load %arg13[%c0_14, %c0_15] : memref<2x128xf32, #tpu.memory_space<vmem>>, vector<2x128xf32>
      %15 = arith.addf %13, %14 : vector<2x128xf32>
      %c0_16 = arith.constant 0 : index
      %c0_17 = arith.constant 0 : index
      %16 = vector.load %arg11[%c0_16, %c0_17] : memref<2x128xf32, #tpu.memory_space<vmem>>, vector<2x128xf32>
      tpu.vector_store %arg11[%c0_16, %c0_17], %15 {strides = array<i32>} : memref<2x128xf32, #tpu.memory_space<vmem>>, vector<2x128xf32>,
    } else {
    }
    return
  }
  func.func @transform_0(%arg0: i32, %arg1: i32) -> (i32, i32) {
    %c0_i32 = arith.constant 0 : i32
    %c0_i32_0 = arith.constant 0 : i32
    return %arg0, %c0_i32 : i32, i32
  }
  func.func @transform_1(%arg0: i32, %arg1: i32) -> (i32, i32, i32) {
    %c0_i32 = arith.constant 0 : i32
    %c0_i32_0 = arith.constant 0 : i32
    return %arg0, %arg1, %c0_i32 : i32, i32, i32
  }
  func.func @transform_2(%arg0: i32, %arg1: i32) -> (i32, i32) {
    %c0_i32 = arith.constant 0 : i32
    %c0_i32_0 = arith.constant 0 : i32
    %c0_i32_1 = arith.constant 0 : i32
    return %c0_i32, %c0_i32_0 : i32, i32
  }
  func.func @transform_3(%arg0: i32, %arg1: i32) -> (i32, i32) {
    %c0_i32 = arith.constant 0 : i32
    %c0_i32_0 = arith.constant 0 : i32
    %c0_i32_1 = arith.constant 0 : i32
    return %c0_i32, %c0_i32_0 : i32, i32
  }
  func.func @transform_4(%arg0: i32, %arg1: i32) -> (i32, i32) {
    %c0_i32 = arith.constant 0 : i32
    %c0_i32_0 = arith.constant 0 : i32
    %c0_i32_1 = arith.constant 0 : i32
    return %c0_i32, %c0_i32_0 : i32, i32
  }
  func.func @transform_5(%arg0: i32, %arg1: i32) -> (i32, i32) {
    %c0_i32 = arith.constant 0 : i32
    %c0_i32_0 = arith.constant 0 : i32
    %c0_i32_1 = arith.constant 0 : i32
    return %c0_i32, %c0_i32_0 : i32, i32
  }
  func.func @transform_6(%arg0: i32, %arg1: i32) -> (i32, i32) {
    %c0_i32 = arith.constant 0 : i32
    %c0_i32_0 = arith.constant 0 : i32
    %c0_i32_1 = arith.constant 0 : i32
    return %c0_i32, %c0_i32_0 : i32, i32
  }
  func.func @transform_7(%arg0: i32, %arg1: i32) -> (i32, i32) {
    %c0_i32 = arith.constant 0 : i32
    %c0_i32_0 = arith.constant 0 : i32
    %c0_i32_1 = arith.constant 0 : i32
    return %c0_i32, %c0_i32_0 : i32, i32
  }
  func.func @transform_8(%arg0: i32, %arg1: i32) -> (i32, i32) {
    %c0_i32 = arith.constant 0 : i32
    %c0_i32_0 = arith.constant 0 : i32
    %c0_i32_1 = arith.constant 0 : i32
    return %c0_i32, %c0_i32_0 : i32, i32
  }
  func.func @transform_9(%arg0: i32, %arg1: i32) -> (i32, i32) {
    %c0_i32 = arith.constant 0 : i32
    %c0_i32_0 = arith.constant 0 : i32
    return %arg0, %c0_i32 : i32, i32
  }
}

</mosaic_0001>

<bundles_post_ra>
// kernel: tpu_custom_call.1
= control target key start
LH: loop header
LB: loop body
LE: loop exit
PB: predicated region body
PF: predicated region fallthrough
CT: control target
= control target key end

     0   :  { %14 = vsyncpa [#allocation5], 0  ;;  %s3753_s0 = inlined_call_operand.hbm [shape: f32[2,4], index: 0, kind: input, shape index: {}]   ;;  %s3754_s1 = inlined_call_operand.hbm [shape: f32[2,16,2560], index: 1, kind: input, shape index: {}]   ;;  %s3755_s2 = inlined_call_operand.hbm [shape: f32[4,256], index: 2, kind: input, shape index: {}]   ;;  %s3756_s3 = inlined_call_operand.hbm [shape: f32[1,256], index: 3, kind: input, shape index: {}]   ;;  %s3757_s4 = inlined_call_operand.hbm [shape: f32[256,256], index: 4, kind: input, shape index: {}]   ;;  %s3758_s5 = inlined_call_operand.hbm [shape: f32[1,256], index: 5, kind: input, shape index: {}]   ;;  %s3759_s6 = inlined_call_operand.hbm [shape: f32[2560,128], index: 6, kind: input, shape index: {}]   ;;  %s3760_s7 = inlined_call_operand.hbm [shape: f32[256,128], index: 7, kind: input, shape index: {}]   ;;  %s3761_s8 = inlined_call_operand.hbm [shape: f32[1,128], index: 8, kind: input, shape index: {}]   ;;  %s3762_s9 = inlined_call_operand.hbm [shape: f32[2,128], index: 9, kind: output, shape index: {}]  }
   0x1   :  { %15 = vsyncpa [#allocation8], 0 }
   0x2   :  { %16 = vsyncpa [#allocation11], 0 }
   0x3   :  { %17 = vsyncpa [#allocation14], 0 }
   0x4   :  { %18 = vsyncpa [#allocation17], 0 }
   0x5   :  { %19 = vsyncpa [#allocation6], 0  ;;  %s3357_s30 = smov [#allocation7]   ;;  %s3125_s13 = scalar_lea.hbm %s3754_s1, 10240 }
   0x6   :  { %s35_s10 = sshll.u32 %s3357_s30, 4  ;;  %p3126_p0 = scmp.ne.s32.totalorder %s3754_s1, %s3125_s13  ;;  %s36_s10 = int_to_ptr.vmem [resolvable:$true] %s35_s10 }
   0x7   :  { %p3129_p1 = scmp.lt.u32.totalorder %s3125_s13, %s3754_s1 }
   0x9   :  { %p3131_p2 = pnand %p3129_p1, %p3126_p0 }
   0xb   :  { %3134 = shalt.err (!%p3131_p2)
}
   0xc   :  { %s3135_s18 = scalar_lea.vmem %s36_s10, 10240  ;;  %p3140_p4 = scmp.lt.s32.totalorder %s36_s10, %s36_s10 }
   0xd   :  { %p3136_p3 = scmp.ne.s32.totalorder %s36_s10, %s3135_s18  ;;  %p3141_p5 = scmp.lt.s32.totalorder %s3135_s18, %s3135_s18 }
   0xf   :  { %p3142_p6 = por %p3141_p5, %p3140_p4 }
  0x11   :  { %p3143_p7 = pnand %p3142_p6, %p3136_p3 }
  0x13   :  { %3146 = shalt.err (!%p3143_p7)
}
  0x14   :  { %s3358_s19 = smov 2560   ;;  %s3359_s20 = smov 160  }
  0x15   :  { %41 = dma.hbm_to_vmem [thread:$0]  %s3754_s1, 10240, %s36_s10, [#allocation8], %s3358_s19, %s3358_s19, %s3359_s20  }
  0x16   :  { %s3360_s23 = smov [#allocation10]   ;;  %s3361_s25 = smov [#allocation13]  }
  0x17   :  { %s58_s24 = sshll.u32 %s3360_s23, 4  ;;  %s80_s26 = sshll.u32 %s3361_s25, 4  ;;  %s59_s24 = int_to_ptr.vmem [resolvable:$true] %s58_s24  ;;  %s81_s26 = int_to_ptr.vmem [resolvable:$true] %s80_s26 }
  0x18   :  { %s3147_s29 = scalar_lea.hbm %s3756_s3, 32 }
  0x19   :  { %p3148_p8 = scmp.ne.s32.totalorder %s3756_s3, %s3147_s29  ;;  %p3151_p9 = scmp.lt.u32.totalorder %s3147_s29, %s3756_s3 }
  0x1b   :  { %p3153_p10 = pnand %p3151_p9, %p3148_p8 }
  0x1d   :  { %3156 = shalt.err (!%p3153_p10)
}
  0x1e   :  { %s3157_s1 = scalar_lea.vmem %s59_s24, 32  ;;  %p3162_p12 = scmp.lt.s32.totalorder %s59_s24, %s59_s24 }
  0x1f   :  { %p3158_p11 = scmp.ne.s32.totalorder %s59_s24, %s3157_s1  ;;  %p3163_p13 = scmp.lt.s32.totalorder %s3157_s1, %s3157_s1 }
  0x21   :  { %p3164_p0 = por %p3163_p13, %p3162_p12 }
  0x23   :  { %p3165_p1 = pnand %p3164_p0, %p3158_p11 }
  0x25   :  { %3168 = shalt.err (!%p3165_p1)
}
  0x26   :  { %61 = dma.hbm_to_vmem [thread:$0]  %s3756_s3, 32, %s59_s24, [#allocation11]  }
  0x27   :  { %s3169_s17 = scalar_lea.hbm %s3758_s5, 32 }
  0x28   :  { %p3170_p2 = scmp.ne.s32.totalorder %s3758_s5, %s3169_s17  ;;  %p3173_p3 = scmp.lt.u32.totalorder %s3169_s17, %s3758_s5 }
  0x2a   :  { %p3175_p4 = pnand %p3173_p3, %p3170_p2 }
  0x2c   :  { %3178 = shalt.err (!%p3175_p4)
}
  0x2d   :  { %s3179_s22 = scalar_lea.vmem %s81_s26, 32  ;;  %p3184_p6 = scmp.lt.s32.totalorder %s81_s26, %s81_s26 }
  0x2e   :  { %p3180_p5 = scmp.ne.s32.totalorder %s81_s26, %s3179_s22  ;;  %p3185_p7 = scmp.lt.s32.totalorder %s3179_s22, %s3179_s22 }
  0x30   :  { %p3186_p8 = por %p3185_p7, %p3184_p6 }
  0x32   :  { %p3187_p9 = pnand %p3186_p8, %p3180_p5 }
  0x34   :  { %3190 = shalt.err (!%p3187_p9)
}
  0x35   :  { %83 = dma.hbm_to_vmem [thread:$0]  %s3758_s5, 32, %s81_s26, [#allocation14]  }
  0x36   :  { %s3362_s24 = smov [#allocation16]   ;;  %s3363_s27 = smov [#allocation4]  }
  0x37   :  { %s101_s25 = sshll.u32 %s3362_s24, 4  ;;  %s26_s28 = sshll.u32 %s3363_s27, 4  ;;  %s102_s25 = int_to_ptr.vmem [resolvable:$true] %s101_s25  ;;  %s27_s28 = int_to_ptr.vmem [resolvable:$true] %s26_s28 }
  0x38   :  { %s3191_s11 = scalar_lea.hbm %s3760_s7, 4096 }
  0x39   :  { %p3192_p10 = scmp.ne.s32.totalorder %s3760_s7, %s3191_s11  ;;  %p3195_p11 = scmp.lt.u32.totalorder %s3191_s11, %s3760_s7 }
  0x3b   :  { %p3197_p12 = pnand %p3195_p11, %p3192_p10 }
  0x3d   :  { %3200 = shalt.err (!%p3197_p12)
}
  0x3e   :  { %s3201_s5 = scalar_lea.vmem %s102_s25, 4096  ;;  %p3206_p0 = scmp.lt.s32.totalorder %s102_s25, %s102_s25 }
  0x3f   :  { %p3202_p13 = scmp.ne.s32.totalorder %s102_s25, %s3201_s5  ;;  %p3207_p1 = scmp.lt.s32.totalorder %s3201_s5, %s3201_s5 }
  0x41   :  { %p3208_p2 = por %p3207_p1, %p3206_p0 }
  0x43   :  { %p3209_p3 = pnand %p3208_p2, %p3202_p13 }
  0x45   :  { %3212 = shalt.err (!%p3209_p3)
}
  0x46   :  { %s3364_s26 = smov 128   ;;  %s3365_s14 = smov 8  }
  0x47   :  { %107 = dma.hbm_to_vmem [thread:$0]  %s3760_s7, 4096, %s102_s25, [#allocation17], %s3364_s26, %s3364_s26, %s3365_s14  }
  0x48   :  { %s3213_s19 = scalar_lea.hbm %s3753_s0, 32 }
  0x49   :  { %p3214_p4 = scmp.ne.s32.totalorder %s3753_s0, %s3213_s19  ;;  %p3217_p5 = scmp.lt.u32.totalorder %s3213_s19, %s3753_s0 }
  0x4b   :  { %p3219_p6 = pnand %p3217_p5, %p3214_p4 }
  0x4d   :  { %3222 = shalt.err (!%p3219_p6)
}
  0x4e   :  { %s3223_s23 = scalar_lea.vmem %s27_s28, 32  ;;  %p3228_p8 = scmp.lt.s32.totalorder %s27_s28, %s27_s28 }
  0x4f   :  { %p3224_p7 = scmp.ne.s32.totalorder %s27_s28, %s3223_s23  ;;  %p3229_p9 = scmp.lt.s32.totalorder %s3223_s23, %s3223_s23 }
  0x51   :  { %p3230_p10 = por %p3229_p9, %p3228_p8 }
  0x53   :  { %p3231_p11 = pnand %p3230_p10, %p3224_p7 }
  0x55   :  { %3234 = shalt.err (!%p3231_p11)
}
  0x56   :  { %29 = dma.hbm_to_vmem [thread:$0]  %s3753_s0, 32, %s27_s28, [#allocation5]  }
  0x57   :  { %s3366_s25 = smov [#allocation9]   ;;  %s3367_s29 = smov [#allocation12]  }
  0x58   :  { %s48_s27 = sshll.u32 %s3366_s25, 4  ;;  %s67_s30 = sshll.u32 %s3367_s29, 4  ;;  %s49_s27 = int_to_ptr.vmem [resolvable:$true] %s48_s27  ;;  %s68_s30 = int_to_ptr.vmem [resolvable:$true] %s67_s30 }
  0x59   :  { %s3235_s13 = scalar_lea.hbm %s3755_s2, 128 }
  0x5a   :  { %p3236_p12 = scmp.ne.s32.totalorder %s3755_s2, %s3235_s13  ;;  %p3239_p13 = scmp.lt.u32.totalorder %s3235_s13, %s3755_s2 }
  0x5c   :  { %p3241_p0 = pnand %p3239_p13, %p3236_p12 }
  0x5e   :  { %3244 = shalt.err (!%p3241_p0)
}
  0x5f   :  { %s3245_s0 = scalar_lea.vmem %s49_s27, 128  ;;  %p3250_p2 = scmp.lt.s32.totalorder %s49_s27, %s49_s27 }
  0x60   :  { %p3246_p1 = scmp.ne.s32.totalorder %s49_s27, %s3245_s0  ;;  %p3251_p3 = scmp.lt.s32.totalorder %s3245_s0, %s3245_s0 }
  0x62   :  { %p3252_p4 = por %p3251_p3, %p3250_p2 }
  0x64   :  { %p3253_p5 = pnand %p3252_p4, %p3246_p1 }
  0x66   :  { %3256 = shalt.err (!%p3253_p5)
}
  0x67   :  { %51 = dma.hbm_to_vmem [thread:$0]  %s3755_s2, 128, %s49_s27, [#allocation8]  }
  0x68   :  { %s3257_s19 = scalar_lea.hbm %s3757_s4, 8192 }
  0x69   :  { %p3258_p6 = scmp.ne.s32.totalorder %s3757_s4, %s3257_s19  ;;  %p3261_p7 = scmp.lt.u32.totalorder %s3257_s19, %s3757_s4 }
  0x6b   :  { %p3263_p8 = pnand %p3261_p7, %p3258_p6 }
  0x6d   :  { %3266 = shalt.err (!%p3263_p8)
}
  0x6e   :  { %s3267_s23 = scalar_lea.vmem %s68_s30, 8192  ;;  %p3272_p10 = scmp.lt.s32.totalorder %s68_s30, %s68_s30 }
  0x6f   :  { %p3268_p9 = scmp.ne.s32.totalorder %s68_s30, %s3267_s23  ;;  %p3273_p11 = scmp.lt.s32.totalorder %s3267_s23, %s3267_s23 }
  0x71   :  { %p3274_p12 = por %p3273_p11, %p3272_p10 }
  0x73   :  { %p3275_p13 = pnand %p3274_p12, %p3268_p9 }
  0x75   :  { %3278 = shalt.err (!%p3275_p13)
}
  0x76   :  { %s3368_s2 = smov 256   ;;  %s3369_s7 = smov 16  }
  0x77   :  { %73 = dma.hbm_to_vmem [thread:$0]  %s3757_s4, 8192, %s68_s30, [#allocation11], %s3368_s2, %s3368_s2, %s3369_s7  }
  0x78   :  { %s3370_s27 = smov [#allocation15]   ;;  %s3371_s11 = smov [#allocation18]  }
  0x79   :  { %s89_s29 = sshll.u32 %s3370_s27, 4  ;;  %s114_s12 = sshll.u32 %s3371_s11, 4  ;;  %s90_s29 = int_to_ptr.vmem [resolvable:$true] %s89_s29  ;;  %s115_s12 = int_to_ptr.vmem [resolvable:$true] %s114_s12 }
  0x7a   :  { %s3279_s10 = scalar_lea.hbm %s3759_s6, 40960 }
  0x7b   :  { %p3280_p0 = scmp.ne.s32.totalorder %s3759_s6, %s3279_s10  ;;  %p3283_p1 = scmp.lt.u32.totalorder %s3279_s10, %s3759_s6 }
  0x7d   :  { %p3285_p2 = pnand %p3283_p1, %p3280_p0 }
  0x7f   :  { %3288 = shalt.err (!%p3285_p2)
}
  0x80   :  { %s3289_s4 = scalar_lea.vmem %s90_s29, 40960  ;;  %p3294_p4 = scmp.lt.s32.totalorder %s90_s29, %s90_s29 }
  0x81   :  { %p3290_p3 = scmp.ne.s32.totalorder %s90_s29, %s3289_s4  ;;  %p3295_p5 = scmp.lt.s32.totalorder %s3289_s4, %s3289_s4 }
  0x83   :  { %p3296_p6 = por %p3295_p5, %p3294_p4 }
  0x85   :  { %p3297_p7 = pnand %p3296_p6, %p3290_p3 }
  0x87   :  { %3300 = shalt.err (!%p3297_p7)
}
  0x88   :  { %95 = dma.hbm_to_vmem [thread:$0]  %s3759_s6, 40960, %s90_s29, [#allocation14], %s3364_s26, %s3364_s26, %s3365_s14  }
  0x89   :  { %s3301_s19 = scalar_lea.hbm %s3761_s8, 16 }
  0x8a   :  { %p3302_p8 = scmp.ne.s32.totalorder %s3761_s8, %s3301_s19  ;;  %p3305_p9 = scmp.lt.u32.totalorder %s3301_s19, %s3761_s8 }
  0x8c   :  { %p3307_p10 = pnand %p3305_p9, %p3302_p8 }
  0x8e   :  { %3310 = shalt.err (!%p3307_p10)
}
  0x8f   :  { %s3311_s23 = scalar_lea.vmem %s115_s12, 16  ;;  %s3315_s2 = scalar_lea.vmem %s115_s12, 32 }
  0x90   :  { %p3312_p11 = scmp.ne.s32.totalorder %s115_s12, %s3311_s23  ;;  %p3316_p12 = scmp.lt.s32.totalorder %s115_s12, %s115_s12 }
  0x91   :  { %p3317_p13 = scmp.lt.s32.totalorder %s3315_s2, %s3311_s23 }
  0x93   :  { %p3318_p0 = por %p3317_p13, %p3316_p12 }
  0x95   :  { %p3319_p1 = pnand %p3318_p0, %p3312_p11 }
  0x97   :  { %3322 = shalt.err (!%p3319_p1)
}
  0x98   :  { %117 = dma.hbm_to_vmem [thread:$0]  %s3761_s8, 16, %s115_s12, [#allocation17]  }
  0x99   :  { %3345 = dma.done.wait [#allocation5], 32  }
  0x9a   :  { %3346 = vsyncadd [#allocation5], 4294967264 }
  0x9b   :  { %3347 = dma.done.wait [#allocation8], 10368  }
  0x9c   :  { %3348 = vsyncadd [#allocation8], 4294956928 }
  0x9d   :  { %3349 = dma.done.wait [#allocation11], 8224  }
  0x9e   :  { %3350 = vsyncadd [#allocation11], 4294959072 }
  0x9f   :  { %3351 = dma.done.wait [#allocation14], 40992  }
  0xa0   :  { %3352 = vsyncadd [#allocation14], 4294926304 }
  0xa1   :  { %3353 = dma.done.wait [#allocation17], 4112  }
  0xa2   :  { %3354 = vsyncadd [#allocation17], 4294963184  ;;  %v3372_v0 = vmov 0.0   ;;  %v155_v1 = vld [vmem:[#allocation9] sm:$0xff]  ;;  %vm174_vm0 = vcmask 1043456   ;;  %v253_v3 = vld [vmem:[#allocation12 + $0x8] sm:$0xff] }
  0xa3   :  { %243 = vmatprep.mubr.f32.mxu0 %v3372_v0  ;;  %v154_v2 = vld [vmem:[#allocation4] sm:$0x3]  ;;  %v169_v4 = vcombine.high %v155_v1, %v155_v1  ;;  %v255_v5 = vld [vmem:[#allocation12 + $0x18] sm:$0xff]  ;;  %v252_v6 = vld [vmem:[#allocation12] sm:$0xff]  ;;  %vm170_vm1 = vcmask 31744   ;;  %vm1091_vm2 = vcmask 1041409  }
  0xa4   :  { %v254_v7 = vld [vmem:[#allocation12 + $0x10] sm:$0xff]  ;;  %v2690_v8 = vpack.c.bf16 %v255_v5, %v253_v3  ;;  %v257_v10 = vld [vmem:[#allocation12 + $0x28] sm:$0xff]  ;;  %v259_v11 = vld [vmem:[#allocation12 + $0x38] sm:$0xff]  ;;  %vm1093_vm3 = vcmask 1043459   ;;  %vm1095_vm4 = vcmask 1045509   ;;  %vm1097_vm5 = vcmask 1047559  }
  0xa5   :  { %v2692_v9 = vpack.c.bf16 %v254_v7, %v252_v6  ;;  %v256_v12 = vld [vmem:[#allocation12 + $0x20] sm:$0xff]  ;;  %2301 = vmatprep.subr.msk.mxu0 %vm174_vm0, %v169_v4  ;;  %v2694_v13 = vpack.c.bf16 %v259_v11, %v257_v10  ;;  %v258_v14 = vld [vmem:[#allocation12 + $0x30] sm:$0xff]  ;;  %v261_v15 = vld [vmem:[#allocation12 + $0x48] sm:$0xff]  ;;  %s3374_s8 = smov [#allocation19]  }
  0xa6   :  { %v263_v16 = vld [vmem:[#allocation12 + $0x58] sm:$0xff]  ;;  %2302 = vmatpush1.msk.msra.mxu0 %vm174_vm0, %v155_v1  ;;  %2691 = vmatprep.subr.bf16.mxu1 %v2690_v8  ;;  %v2696_v17 = vpack.c.bf16 %v258_v14, %v256_v12  ;;  %v260_v19 = vld [vmem:[#allocation12 + $0x40] sm:$0xff]  ;;  %v262_v20 = vld [vmem:[#allocation12 + $0x50] sm:$0xff]  ;;  %s2288_s14 = sshll.u32 %s3374_s8, 4  ;;  %s2289_s14 = int_to_ptr.vmem [resolvable:$true] %s2288_s14 }
  0xa7   :  { %2303 = vmatmul.mubr.msk.f32.vlgmr.msra.gmra.mrb[0].mxu0 %vm170_vm1, %v154_v2  ;;  %2693 = vmatpush1.bf16.msra.mxu1 %v2692_v9  ;;  %v2698_v18 = vpack.c.bf16 %v263_v16, %v261_v15  ;;  %v265_v21 = vld [vmem:[#allocation12 + $0x68] sm:$0xff]  ;;  %v267_v22 = vld [vmem:[#allocation12 + $0x78] sm:$0xff]  ;;  %v2700_v23 = vpack.c.bf16 %v262_v20, %v260_v19  ;;  %v264_v25 = vld [vmem:[#allocation12 + $0x60] sm:$0xff]  ;;  %s3323_s7 = scalar_lea.vmem %s2289_s14, 32  ;;  %p3328_p3 = scmp.lt.s32.totalorder %s2289_s14, %s2289_s14 }
  0xa8   :  { %2695 = vmatprep.subr.bf16.mxu1 %v2694_v13  ;;  %v2702_v24 = vpack.c.bf16 %v267_v22, %v265_v21  ;;  %v266_v26 = vld [vmem:[#allocation12 + $0x70] sm:$0xff]  ;;  %v269_v27 = vld [vmem:[#allocation12 + $0x88] sm:$0xff]  ;;  %v271_v28 = vld [vmem:[#allocation12 + $0x98] sm:$0xff]  ;;  %p3324_p2 = scmp.ne.s32.totalorder %s2289_s14, %s3323_s7  ;;  %p3329_p4 = scmp.lt.s32.totalorder %s3323_s7, %s3323_s7 }
  0xa9   :  { %v2704_v29 = vpack.c.bf16 %v266_v26, %v264_v25  ;;  %v2706_v30 = vpack.c.bf16 %v271_v28, %v269_v27  ;;  %v268_v31 = vld [vmem:[#allocation12 + $0x80] sm:$0xff]  ;;  %v270_v32 = vld [vmem:[#allocation12 + $0x90] sm:$0xff]  ;;  %v273_v33 = vld [vmem:[#allocation12 + $0xa8] sm:$0xff] }
  0xaa   :  { %v275_v34 = vld [vmem:[#allocation12 + $0xb8] sm:$0xff]  ;;  %v2708_v35 = vpack.c.bf16 %v270_v32, %v268_v31  ;;  %v272_v37 = vld [vmem:[#allocation12 + $0xa0] sm:$0xff]  ;;  %v274_v38 = vld [vmem:[#allocation12 + $0xb0] sm:$0xff]  ;;  %p3330_p5 = por %p3329_p4, %p3328_p3 }
  0xab   :  { %2697 = vmatpush1.bf16.msra.mxu1 %v2696_v17  ;;  %v2710_v36 = vpack.c.bf16 %v275_v34, %v273_v33  ;;  %v277_v39 = vld [vmem:[#allocation12 + $0xc8] sm:$0xff]  ;;  %v279_v40 = vld [vmem:[#allocation12 + $0xd8] sm:$0xff]  ;;  %v2712_v41 = vpack.c.bf16 %v274_v38, %v272_v37  ;;  %v276_v43 = vld [vmem:[#allocation12 + $0xc0] sm:$0xff] }
  0xac   :  { %2699 = vmatprep.subr.bf16.mxu1 %v2698_v18  ;;  %v2714_v42 = vpack.c.bf16 %v279_v40, %v277_v39  ;;  %v278_v44 = vld [vmem:[#allocation12 + $0xd0] sm:$0xff]  ;;  %v281_v45 = vld [vmem:[#allocation12 + $0xe8] sm:$0xff]  ;;  %v283_v46 = vld [vmem:[#allocation12 + $0xf8] sm:$0xff]  ;;  %p3331_p6 = pnand %p3330_p5, %p3324_p2 }
  0xad   :  { %v2716_v47 = vpack.c.bf16 %v278_v44, %v276_v43  ;;  %v2718_v48 = vpack.c.bf16 %v283_v46, %v281_v45  ;;  %v280_v49 = vld [vmem:[#allocation12 + $0xe0] sm:$0xff]  ;;  %v282_v50 = vld [vmem:[#allocation12 + $0xf0] sm:$0xff]  ;;  %v285_v51 = vld [vmem:[#allocation12 + $0x108] sm:$0xff] }
  0xae   :  { %v287_v52 = vld [vmem:[#allocation12 + $0x118] sm:$0xff]  ;;  %v2720_v53 = vpack.c.bf16 %v282_v50, %v280_v49  ;;  %v284_v55 = vld [vmem:[#allocation12 + $0x100] sm:$0xff]  ;;  %v286_v56 = vld [vmem:[#allocation12 + $0x110] sm:$0xff] }
  0xaf   :  { %2701 = vmatpush1.bf16.msra.mxu1 %v2700_v23  ;;  %v2722_v54 = vpack.c.bf16 %v287_v52, %v285_v51  ;;  %v289_v57 = vld [vmem:[#allocation12 + $0x128] sm:$0xff]  ;;  %v291_v58 = vld [vmem:[#allocation12 + $0x138] sm:$0xff]  ;;  %v2724_v59 = vpack.c.bf16 %v286_v56, %v284_v55  ;;  %v288_v61 = vld [vmem:[#allocation12 + $0x120] sm:$0xff] }
  0xb0   :  { %2703 = vmatprep.subr.bf16.mxu1 %v2702_v24  ;;  %v2726_v60 = vpack.c.bf16 %v291_v58, %v289_v57  ;;  %v290_v62 = vld [vmem:[#allocation12 + $0x130] sm:$0xff]  ;;  %v293_v63 = vld [vmem:[#allocation12 + $0x148] sm:$0xff]  ;;  %v295_v0 = vld [vmem:[#allocation12 + $0x158] sm:$0xff] }
  0xb1   :  { %v2728_v1 = vpack.c.bf16 %v290_v62, %v288_v61  ;;  %v2730_v2 = vpack.c.bf16 %v295_v0, %v293_v63  ;;  %v292_v3 = vld [vmem:[#allocation12 + $0x140] sm:$0xff]  ;;  %v294_v4 = vld [vmem:[#allocation12 + $0x150] sm:$0xff]  ;;  %v297_v5 = vld [vmem:[#allocation12 + $0x168] sm:$0xff] }
  0xb2   :  { %v299_v6 = vld [vmem:[#allocation12 + $0x178] sm:$0xff]  ;;  %v2732_v7 = vpack.c.bf16 %v294_v4, %v292_v3  ;;  %v296_v9 = vld [vmem:[#allocation12 + $0x160] sm:$0xff]  ;;  %v298_v10 = vld [vmem:[#allocation12 + $0x170] sm:$0xff] }
  0xb3   :  { %2705 = vmatpush1.bf16.msra.mxu1 %v2704_v29  ;;  %v2734_v8 = vpack.c.bf16 %v299_v6, %v297_v5  ;;  %v301_v11 = vld [vmem:[#allocation12 + $0x188] sm:$0xff]  ;;  %v303_v12 = vld [vmem:[#allocation12 + $0x198] sm:$0xff]  ;;  %v2736_v13 = vpack.c.bf16 %v298_v10, %v296_v9  ;;  %v300_v15 = vld [vmem:[#allocation12 + $0x180] sm:$0xff] }
  0xb4   :  { %2707 = vmatprep.subr.bf16.mxu1 %v2706_v30  ;;  %v2738_v14 = vpack.c.bf16 %v303_v12, %v301_v11  ;;  %v302_v16 = vld [vmem:[#allocation12 + $0x190] sm:$0xff]  ;;  %v305_v17 = vld [vmem:[#allocation12 + $0x1a8] sm:$0xff]  ;;  %v307_v18 = vld [vmem:[#allocation12 + $0x1b8] sm:$0xff] }
  0xb5   :  { %v2740_v19 = vpack.c.bf16 %v302_v16, %v300_v15  ;;  %v2742_v20 = vpack.c.bf16 %v307_v18, %v305_v17  ;;  %v304_v21 = vld [vmem:[#allocation12 + $0x1a0] sm:$0xff]  ;;  %v306_v22 = vld [vmem:[#allocation12 + $0x1b0] sm:$0xff]  ;;  %v309_v23 = vld [vmem:[#allocation12 + $0x1c8] sm:$0xff] }
  0xb6   :  { %v311_v24 = vld [vmem:[#allocation12 + $0x1d8] sm:$0xff]  ;;  %v2744_v25 = vpack.c.bf16 %v306_v22, %v304_v21  ;;  %v308_v27 = vld [vmem:[#allocation12 + $0x1c0] sm:$0xff]  ;;  %v310_v28 = vld [vmem:[#allocation12 + $0x1d0] sm:$0xff] }
  0xb7   :  { %2709 = vmatpush1.bf16.msra.mxu1 %v2708_v35  ;;  %v2746_v26 = vpack.c.bf16 %v311_v24, %v309_v23  ;;  %v2748_v29 = vpack.c.bf16 %v310_v28, %v308_v27  ;;  %v313_v30 = vld [vmem:[#allocation12 + $0x1e8] sm:$0xff]  ;;  %v315_v31 = vld [vmem:[#allocation12 + $0x1f8] sm:$0xff]  ;;  %v312_v33 = vld [vmem:[#allocation12 + $0x1e0] sm:$0xff] }
  0xb8   :  { %2711 = vmatprep.subr.bf16.mxu1 %v2710_v36  ;;  %v2750_v32 = vpack.c.bf16 %v315_v31, %v313_v30  ;;  %v314_v34 = vld [vmem:[#allocation12 + $0x1f0] sm:$0xff]  ;;  %v417_v36 = vld [vmem:[#allocation16 + $0x80] sm:$0xff]  ;;  %v404_v46 = vld [vmem:[#allocation16 + $0x18] sm:$0xff] }
  0xb9   :  { %v2752_v35 = vpack.c.bf16 %v314_v34, %v312_v33  ;;  %v418_v37 = vld [vmem:[#allocation16 + $0x88] sm:$0xff]  ;;  %v401_v38 = vld [vmem:[#allocation16] sm:$0xff]  ;;  %v403_v45 = vld [vmem:[#allocation16 + $0x10] sm:$0xff] }
  0xba   :  { %v2754_v39 = vpack.c.bf16 %v418_v37, %v417_v36  ;;  %v402_v40 = vld [vmem:[#allocation16 + $0x8] sm:$0xff]  ;;  %v2760_v49 = vpack.c.bf16 %v404_v46, %v403_v45  ;;  %v405_v51 = vld [vmem:[#allocation16 + $0x20] sm:$0xff]  ;;  %v407_v57 = vld [vmem:[#allocation16 + $0x30] sm:$0xff] }
  0xbb   :  { %2713 = vmatpush1.bf16.msra.mxu1 %v2712_v41  ;;  %v419_v41 = vld [vmem:[#allocation16 + $0x90] sm:$0xff]  ;;  %v2756_v43 = vpack.c.bf16 %v402_v40, %v401_v38  ;;  %v406_v52 = vld [vmem:[#allocation16 + $0x28] sm:$0xff]  ;;  %v408_v58 = vld [vmem:[#allocation16 + $0x38] sm:$0xff] }
  0xbc   :  { %2715 = vmatprep.subr.bf16.mxu1 %v2714_v42  ;;  %v420_v42 = vld [vmem:[#allocation16 + $0x98] sm:$0xff]  ;;  %2755 = vmatprep.subr.bf16.mxu0 %v2754_v39  ;;  %v2764_v55 = vpack.c.bf16 %v406_v52, %v405_v51  ;;  %v2768_v61 = vpack.c.bf16 %v408_v58, %v407_v57  ;;  %v409_v63 = vld [vmem:[#allocation16 + $0x40] sm:$0xff]  ;;  %v410_v0 = vld [vmem:[#allocation16 + $0x48] sm:$0xff] }
  0xbd   :  { %v2758_v44 = vpack.c.bf16 %v420_v42, %v419_v41  ;;  %2757 = vmatpush3.bf16.msra.mxu0 %v2756_v43  ;;  %v2772_v3 = vpack.c.bf16 %v410_v0, %v409_v63  ;;  %v411_v5 = vld [vmem:[#allocation16 + $0x50] sm:$0xff]  ;;  %v412_v6 = vld [vmem:[#allocation16 + $0x58] sm:$0xff]  ;;  %v413_v11 = vld [vmem:[#allocation16 + $0x60] sm:$0xff] }
  0xbe   :  { %v2776_v9 = vpack.c.bf16 %v412_v6, %v411_v5  ;;  %v414_v12 = vld [vmem:[#allocation16 + $0x68] sm:$0xff]  ;;  %v156_v17 = vld [vmem:[#allocation10] sm:$0x3]  ;;  %v431_v27 = vld [vmem:[#allocation16 + $0xf0] sm:$0xff] }
  0xbf   :  { %2717 = vmatpush1.bf16.msra.mxu1 %v2716_v47  ;;  %v421_v47 = vld [vmem:[#allocation16 + $0xa0] sm:$0xff]  ;;  %2759 = vmatprep.subr.bf16.mxu0 %v2758_v44  ;;  %v432_v28 = vld [vmem:[#allocation16 + $0xf8] sm:$0xff]  ;;  %v415_v30 = vld [vmem:[#allocation16 + $0x70] sm:$0xff] }
  0xc0   :  { %2719 = vmatprep.subr.bf16.mxu1 %v2718_v48  ;;  %v422_v48 = vld [vmem:[#allocation16 + $0xa8] sm:$0xff]  ;;  %v416_v31 = vld [vmem:[#allocation16 + $0x78] sm:$0xff]  ;;  %v1166_v33 = vld [vmem:[#allocation15 + $0x80] sm:$0xff] }
  0xc1   :  { %v2762_v50 = vpack.c.bf16 %v422_v48, %v421_v47  ;;  %2761 = vmatpush3.bf16.msra.mxu0 %v2760_v49  ;;  %v1167_v34 = vld [vmem:[#allocation15 + $0x88] sm:$0xff]  ;;  %v1198_v36 = vld [vmem:[#allocation15 + $0x180] sm:$0xff]  ;;  %v1200_v42 = vld [vmem:[#allocation15 + $0x190] sm:$0xff] }
  0xc2   :  { %v1199_v37 = vld [vmem:[#allocation15 + $0x188] sm:$0xff]  ;;  %v1182_v39 = vld [vmem:[#allocation15 + $0x100] sm:$0xff]  ;;  %v1201_v43 = vld [vmem:[#allocation15 + $0x198] sm:$0xff] }
  0xc3   :  { %2721 = vmatpush1.bf16.msra.mxu1 %v2720_v53  ;;  %v423_v53 = vld [vmem:[#allocation16 + $0xb0] sm:$0xff]  ;;  %2763 = vmatprep.subr.bf16.mxu0 %v2762_v50  ;;  %v2818_v38 = vpack.c.bf16 %v1199_v37, %v1198_v36  ;;  %v1183_v40 = vld [vmem:[#allocation15 + $0x108] sm:$0xff]  ;;  %v1185_v45 = vld [vmem:[#allocation15 + $0x118] sm:$0xff]  ;;  %v2822_v46 = vpack.c.bf16 %v1201_v43, %v1200_v42 }
  0xc4   :  { %2723 = vmatprep.subr.bf16.mxu1 %v2722_v54  ;;  %v424_v54 = vld [vmem:[#allocation16 + $0xb8] sm:$0xff]  ;;  %v2820_v41 = vpack.c.bf16 %v1183_v40, %v1182_v39  ;;  %v1184_v44 = vld [vmem:[#allocation15 + $0x110] sm:$0xff]  ;;  %v1202_v50 = vld [vmem:[#allocation15 + $0x1a0] sm:$0xff] }
  0xc5   :  { %v2766_v56 = vpack.c.bf16 %v424_v54, %v423_v53  ;;  %2765 = vmatpush3.bf16.msra.mxu0 %v2764_v55  ;;  %v2824_v47 = vpack.c.bf16 %v1185_v45, %v1184_v44  ;;  %v516_v48 = vld [vmem:[#allocation7] sm:$0xff]  ;;  %v517_v49 = vld [vmem:[#allocation7 + $0x8] sm:$0xff]  ;;  %v518_v51 = vld [vmem:[#allocation7 + $0x10] sm:$0xff] }
  0xc6   :  { %v519_v52 = vld [vmem:[#allocation7 + $0x18] sm:$0xff]  ;;  %v1186_v54 = vld [vmem:[#allocation15 + $0x120] sm:$0xff]  ;;  %v536_v58 = vld [vmem:[#allocation7 + $0xa0] sm:$0xff] }
  0xc7   :  { %2725 = vmatpush1.bf16.msra.mxu1 %v2724_v59  ;;  %v425_v59 = vld [vmem:[#allocation16 + $0xc0] sm:$0xff]  ;;  %2767 = vmatprep.subr.bf16.mxu0 %v2766_v56  ;;  %v1203_v53 = vld [vmem:[#allocation15 + $0x1a8] sm:$0xff]  ;;  %v596_v63 = vadd.f32 %v536_v58, %v516_v48  ;;  %v1205_v6 = vld [vmem:[#allocation15 + $0x1b8] sm:$0xff] }
  0xc8   :  { %2727 = vmatprep.subr.bf16.mxu1 %v2726_v60  ;;  %v426_v60 = vld [vmem:[#allocation16 + $0xc8] sm:$0xff]  ;;  %v2826_v56 = vpack.c.bf16 %v1203_v53, %v1202_v50  ;;  %v1208_v40 = vld [vmem:[#allocation15 + $0x1d0] sm:$0xff]  ;;  %v1209_v44 = vld [vmem:[#allocation15 + $0x1d8] sm:$0xff] }
  0xc9   :  { %v2770_v62 = vpack.c.bf16 %v426_v60, %v425_v59  ;;  %2769 = vmatpush3.bf16.msra.mxu0 %v2768_v61  ;;  %v1187_v55 = vld [vmem:[#allocation15 + $0x128] sm:$0xff]  ;;  %v537_v59 = vld [vmem:[#allocation7 + $0xa8] sm:$0xff]  ;;  %v1192_v45 = vld [vmem:[#allocation15 + $0x150] sm:$0xff] }
  0xca   :  { %v2828_v57 = vpack.c.bf16 %v1187_v55, %v1186_v54  ;;  %v538_v60 = vld [vmem:[#allocation7 + $0xb0] sm:$0xff]  ;;  %v539_v61 = vld [vmem:[#allocation7 + $0xb8] sm:$0xff]  ;;  %v603_v0 = vadd.f32 %v537_v59, %v517_v49  ;;  %v2838_v49 = vpack.c.bf16 %v1209_v44, %v1208_v40 }
  0xcb   :  { %2729 = vmatpush1.bf16.msra.mxu1 %v2728_v1  ;;  %v427_v1 = vld [vmem:[#allocation16 + $0xd0] sm:$0xff]  ;;  %2771 = vmatprep.subr.bf16.mxu0 %v2770_v62  ;;  %v617_v5 = vadd.f32 %v539_v61, %v519_v52  ;;  %v1210_v58 = vld [vmem:[#allocation15 + $0x1e0] sm:$0xff] }
  0xcc   :  { %2731 = vmatprep.subr.bf16.mxu1 %v2730_v2  ;;  %v428_v2 = vld [vmem:[#allocation16 + $0xd8] sm:$0xff]  ;;  %v579_v52 = vld [vmem:[#allocation7 + $0x1f8] sm:$0xff] }
  0xcd   :  { %v2774_v4 = vpack.c.bf16 %v428_v2, %v427_v1  ;;  %2773 = vmatpush3.bf16.msra.mxu0 %v2772_v3  ;;  %v556_v62 = vld [vmem:[#allocation7 + $0x140] sm:$0xff]  ;;  %v610_v1 = vadd.f32 %v538_v60, %v518_v51  ;;  %v557_v3 = vld [vmem:[#allocation7 + $0x148] sm:$0xff]  ;;  %v559_v51 = vld [vmem:[#allocation7 + $0x158] sm:$0xff] }
  0xce   :  { %v1204_v2 = vld [vmem:[#allocation15 + $0x1b0] sm:$0xff] }
  0xcf   :  { %2733 = vmatpush1.bf16.msra.mxu1 %v2732_v7  ;;  %v429_v7 = vld [vmem:[#allocation16 + $0xe0] sm:$0xff]  ;;  %2775 = vmatprep.subr.bf16.mxu0 %v2774_v4 }
  0xd0   :  { %2735 = vmatprep.subr.bf16.mxu1 %v2734_v8  ;;  %v430_v8 = vld [vmem:[#allocation16 + $0xe8] sm:$0xff] }
  0xd1   :  { %v2778_v10 = vpack.c.bf16 %v430_v8, %v429_v7  ;;  %2777 = vmatpush3.bf16.msra.mxu0 %v2776_v9  ;;  %v558_v4 = vld [vmem:[#allocation7 + $0x150] sm:$0xff]  ;;  %v1188_v7 = vld [vmem:[#allocation15 + $0x130] sm:$0xff]  ;;  %v1189_v8 = vld [vmem:[#allocation15 + $0x138] sm:$0xff]  ;;  %v597_v9 = vrot.slane %v596_v63, 4 }
  0xd3   :  { %2737 = vmatpush1.bf16.msra.mxu1 %v2736_v13  ;;  %v2780_v13 = vpack.c.bf16 %v414_v12, %v413_v11  ;;  %2779 = vmatprep.subr.bf16.mxu0 %v2778_v10  ;;  %v604_v10 = vrot.slane %v603_v0, 4  ;;  %v611_v11 = vrot.slane %v610_v1, 4  ;;  %v2830_v12 = vpack.c.bf16 %v1205_v6, %v1204_v2 }
  0xd4   :  { %2739 = vmatprep.subr.bf16.mxu1 %v2738_v14  ;;  %v158_v14 = vlaneseq }
  0xd5   :  { %2781 = vmatpush3.bf16.msra.mxu0 %v2780_v13  ;;  %v2832_v13 = vpack.c.bf16 %v1189_v8, %v1188_v7 }
  0xd6   :  { %v3541_v15 = vshrl.u32 %v158_v14, 7  ;;  %v576_v14 = vld [vmem:[#allocation7 + $0x1e0] sm:$0xff] }
  0xd7   :  { %2741 = vmatpush1.bf16.msra.mxu1 %v2740_v19 }
  0xd8   :  { %2743 = vmatprep.subr.bf16.mxu1 %v2742_v20  ;;  %v160_v16 = vsub.s32 0, %v3541_v15  ;;  %v164_v18 = vsub.s32 1, %v3541_v15 }
  0xda   :  { %v161_v19 = vrot.slane %v156_v17, %v160_v16  ;;  %v165_v20 = vrot.slane %v156_v17, %v164_v18  ;;  %v577_v17 = vld [vmem:[#allocation7 + $0x1e8] sm:$0xff] }
  0xdb   :  { %2745 = vmatpush1.bf16.msra.mxu1 %v2744_v25 }
  0xdc   :  { %2747 = vmatprep.subr.bf16.mxu1 %v2746_v26 }
  0xdf   :  { %2749 = vmatpush1.bf16.msra.mxu1 %v2748_v29  ;;  %v2782_v29 = vpack.c.bf16 %v432_v28, %v431_v27  ;;  %v743_v27 = vadd.f32 %v577_v17, %v557_v3  ;;  %v1213_v17 = vld [vmem:[#allocation15 + $0x1f8] sm:$0xff] }
  0xe0   :  { %2751 = vmatprep.subr.bf16.mxu1 %v2750_v32  ;;  %v2784_v32 = vpack.c.bf16 %v416_v31, %v415_v30  ;;  %v1190_v30 = vld [vmem:[#allocation15 + $0x140] sm:$0xff]  ;;  %v1191_v31 = vld [vmem:[#allocation15 + $0x148] sm:$0xff] }
  0xe1   :  { %2783 = vmatprep.subr.bf16.mxu0 %v2782_v29  ;;  %v1207_v29 = vld [vmem:[#allocation15 + $0x1c8] sm:$0xff]  ;;  %v2836_v36 = vpack.c.bf16 %v1191_v31, %v1190_v30  ;;  %v744_v39 = vrot.slane %v743_v27, 4 }
  0xe2   :  { %2785 = vmatpush3.bf16.msra.mxu0 %v2784_v32 }
  0xe3   :  { %2753 = vmatpush1.bf16.msra.mxu1 %v2752_v35  ;;  %v2786_v35 = vpack.c.bf16 %v1167_v34, %v1166_v33  ;;  %v745_v55 = vadd.f32 %v744_v39, %v743_v27 }
  0xe4   :  { %2819 = vmatprep.subr.bf16.mxu1 %v2818_v38 }
  0xe5   :  { %2787 = vmatprep.subr.bf16.mxu0 %v2786_v35  ;;  %v746_v3 = vrot.slane %v745_v55, 2 }
 0x17a   :  { %v245_v21 = vpop.f32.mrb[0].mxu0 }
 0x17b   :  { %v246_v22 = vadd.f32 %v245_v21, %v161_v19  ;;  %v247_v23 = vpop.f32.mrb[1].mxu0  ;;  %v578_v19 = vld [vmem:[#allocation7 + $0x1f0] sm:$0xff]  ;;  %v598_v21 = vadd.f32 %v597_v9, %v596_v63 }
 0x17c   :  { %v248_v24 = vadd.f32 %v247_v23, %v165_v20  ;;  %v618_v20 = vrot.slane %v617_v5, 4  ;;  %v612_v23 = vadd.f32 %v611_v11, %v610_v1  ;;  %v750_v28 = vadd.f32 %v578_v19, %v558_v4  ;;  %v1194_v63 = vld [vmem:[#allocation15 + $0x160] sm:$0xff]  ;;  %v1196_v19 = vld [vmem:[#allocation15 + $0x170] sm:$0xff] }
 0x17d   :  { %v250_v26 = vmax.f32 %v246_v22, 0.0  ;;  %v605_v22 = vadd.f32 %v604_v10, %v603_v0  ;;  %v599_v32 = vrot.slane %v598_v21, 2  ;;  %v1195_v0 = vld [vmem:[#allocation15 + $0x168] sm:$0xff]  ;;  %v757_v4 = vadd.f32 %v579_v52, %v559_v51 }
 0x17e   :  { %v251_v25 = vmax.f32 %v248_v24, 0.0  ;;  %v736_v24 = vadd.f32 %v576_v14, %v556_v62  ;;  %v613_v34 = vrot.slane %v612_v23, 2  ;;  %v751_v43 = vrot.slane %v750_v28, 4  ;;  %v1211_v62 = vld [vmem:[#allocation15 + $0x1e8] sm:$0xff] }
 0x17f   :  { %v606_v33 = vrot.slane %v605_v22, 2  ;;  %v2844_v6 = vpack.c.bf16 %v1195_v0, %v1194_v63  ;;  %v747_v10 = vadd.f32 %v746_v3, %v745_v55  ;;  %v758_v11 = vrot.slane %v757_v4, 4  ;;  %v523_v52 = vld [vmem:[#allocation7 + $0x38] sm:$0xff]  ;;  %v541_v55 = vld [vmem:[#allocation7 + $0xc8] sm:$0xff]  ;;  %v560_v0 = vld [vmem:[#allocation7 + $0x160] sm:$0xff] }
 0x180   :  { %392 = vmatprep.mubr.f32.mxu1 %v251_v25  ;;  %v1206_v25 = vld [vmem:[#allocation15 + $0x1c0] sm:$0xff]  ;;  %v737_v38 = vrot.slane %v736_v24, 4  ;;  %v614_v48 = vadd.f32 %v613_v34, %v612_v23  ;;  %v752_v61 = vadd.f32 %v751_v43, %v750_v28  ;;  %v580_v3 = vld [vmem:[#allocation7 + $0x200] sm:$0xff] }
 0x181   :  { %393 = vmatmul.mubr.f32.vlgmr.msra.gmra.mrb[0].mxu1 %v250_v26  ;;  %v619_v26 = vadd.f32 %v618_v20, %v617_v5  ;;  %v2834_v35 = vpack.c.bf16 %v1207_v29, %v1206_v25  ;;  %v2842_v5 = vpack.c.bf16 %v1211_v62, %v1210_v58  ;;  %v1197_v20 = vld [vmem:[#allocation15 + $0x178] sm:$0xff]  ;;  %v748_v23 = vrot.slane %v747_v10, 1  ;;  %v543_v58 = vld [vmem:[#allocation7 + $0xd8] sm:$0xff] }
 0x182   :  { %2821 = vmatpush3.bf16.msra.mxu1 %v2820_v41  ;;  %v600_v41 = vadd.f32 %v599_v32, %v598_v21  ;;  %v738_v42 = vadd.f32 %v737_v38, %v736_v24  ;;  %v615_v2 = vrot.slane %v614_v48, 1  ;;  %v753_v8 = vrot.slane %v752_v61, 2 }
 0x183   :  { %2823 = vmatprep.subr.bf16.mxu1 %v2822_v46  ;;  %v620_v37 = vrot.slane %v619_v26, 2  ;;  %v1193_v46 = vld [vmem:[#allocation15 + $0x158] sm:$0xff]  ;;  %v759_v24 = vadd.f32 %v758_v11, %v757_v4  ;;  %v749_v30 = vadd.f32 %v748_v23, %v747_v10  ;;  %v645_v62 = vadd.f32 %v543_v58, %v523_v52 }
 0x184   :  { %v2840_v50 = vpack.c.bf16 %v1193_v46, %v1192_v45  ;;  %v739_v54 = vrot.slane %v738_v42, 2  ;;  %v601_v59 = vrot.slane %v600_v41, 1  ;;  %v754_v14 = vadd.f32 %v753_v8, %v752_v61  ;;  %v561_v23 = vld [vmem:[#allocation7 + $0x168] sm:$0xff] }
 0x185   :  { %v621_v53 = vadd.f32 %v620_v37, %v619_v26  ;;  %v2848_v26 = vpack.c.bf16 %v1197_v20, %v1196_v19  ;;  %v616_v27 = vadd.f32 %v615_v2, %v614_v48  ;;  %v760_v32 = vrot.slane %v759_v24, 2  ;;  %v520_v48 = vld [vmem:[#allocation7 + $0x20] sm:$0xff]  ;;  %v1246_v19 = vld [vmem:[#allocation15 + $0x300] sm:$0xff]  ;;  %v1247_v20 = vld [vmem:[#allocation15 + $0x308] sm:$0xff] }
 0x186   :  { %2825 = vmatpush3.bf16.msra.mxu1 %v2824_v47  ;;  %v607_v47 = vadd.f32 %v606_v33, %v605_v22  ;;  %v740_v60 = vadd.f32 %v739_v54, %v738_v42  ;;  %v602_v21 = vadd.f32 %v601_v59, %v600_v41  ;;  %v755_v31 = vrot.slane %v754_v14, 1  ;;  %v1262_v33 = vld [vmem:[#allocation15 + $0x380] sm:$0xff]  ;;  %v540_v54 = vld [vmem:[#allocation7 + $0xc0] sm:$0xff] }
 0x187   :  { %2827 = vmatprep.subr.bf16.mxu1 %v2826_v56  ;;  %v3373_v56 = vmov 1983009808   ;;  %v622_v7 = vrot.slane %v621_v53, 1  ;;  %v761_v34 = vadd.f32 %v760_v32, %v759_v24  ;;  %v624_v59 = vadd.f32 %v540_v54, %v520_v48  ;;  %v562_v24 = vld [vmem:[#allocation7 + $0x170] sm:$0xff]  ;;  %v581_v32 = vld [vmem:[#allocation7 + $0x208] sm:$0xff] }
 0x188   :  { %v608_v1 = vrot.slane %v607_v47, 1  ;;  %v741_v9 = vrot.slane %v740_v60, 1  ;;  %v756_v40 = vadd.f32 %v755_v31, %v754_v14  ;;  %v563_v31 = vld [vmem:[#allocation7 + $0x178] sm:$0xff]  ;;  %v771_v48 = vadd.f32 %v581_v32, %v561_v23 }
 0x189   :  { %v623_v28 = vadd.f32 %v622_v7, %v621_v53  ;;  %v762_v41 = vrot.slane %v761_v34, 1  ;;  %v1255_v32 = vld [vmem:[#allocation15 + $0x348] sm:$0xff] }
 0x18a   :  { %2829 = vmatpush3.bf16.msra.mxu1 %v2828_v57  ;;  %v919_v57 = vunpack.c.l.s4 %v3373_v56  ;;  %v609_v22 = vadd.f32 %v608_v1, %v607_v47  ;;  %v742_v29 = vadd.f32 %v741_v9, %v740_v60  ;;  %v542_v56 = vld [vmem:[#allocation7 + $0xd0] sm:$0xff]  ;;  %v625_v1 = vrot.slane %v624_v59, 4 }
 0x18b   :  { %2831 = vmatprep.subr.bf16.mxu1 %v2830_v12  ;;  %v917_v37 = vcombine.low %v616_v27, %v623_v28  ;;  %v763_v43 = vadd.f32 %v762_v41, %v761_v34  ;;  %v1248_v34 = vld [vmem:[#allocation15 + $0x310] sm:$0xff] }
 0x18c   :  { %v920_v12 = vunpack.c.0.s8 %v919_v57  ;;  %v1001_v42 = vcombine.low %v742_v29, %v749_v30  ;;  %v626_v7 = vadd.f32 %v625_v1, %v624_v59  ;;  %v1264_v29 = vld [vmem:[#allocation15 + $0x390] sm:$0xff]  ;;  %v1265_v30 = vld [vmem:[#allocation15 + $0x398] sm:$0xff] }
 0x18d   :  { %v1002_v46 = vcombine.low %v756_v40, %v763_v43  ;;  %v1267_v40 = vld [vmem:[#allocation15 + $0x3a8] sm:$0xff] }
 0x18e   :  { %2833 = vmatpush3.bf16.msra.mxu1 %v2832_v13  ;;  %v1212_v13 = vld [vmem:[#allocation15 + $0x1f0] sm:$0xff]  ;;  %v3550_v39 = vsub.s32 %v920_v12, %v3541_v15  ;;  %v764_v12 = vadd.f32 %v580_v3, %v560_v0 }
 0x18f   :  { %2835 = vmatprep.subr.bf16.mxu1 %v2834_v35  ;;  %v2846_v25 = vpack.c.bf16 %v1213_v17, %v1212_v13  ;;  %v1263_v35 = vld [vmem:[#allocation15 + $0x388] sm:$0xff] }
 0x190   :  { %v2882_v38 = vpack.c.bf16 %v1263_v35, %v1262_v33  ;;  %v931_v45 = vrot.slane %v917_v37, %v3550_v39  ;;  %v1009_v47 = vrot.slane %v1001_v42, %v3550_v39  ;;  %v1016_v51 = vrot.slane %v1002_v46, %v3550_v39  ;;  %v1249_v35 = vld [vmem:[#allocation15 + $0x318] sm:$0xff]  ;;  %v583_v41 = vld [vmem:[#allocation7 + $0x218] sm:$0xff] }
 0x191   :  { %v765_v27 = vrot.slane %v764_v12, 4  ;;  %v2884_v33 = vpack.c.bf16 %v1247_v20, %v1246_v19  ;;  %v785_v54 = vadd.f32 %v583_v41, %v563_v31  ;;  %v1271_v19 = vld [vmem:[#allocation15 + $0x3c8] sm:$0xff] }
 0x192   :  { %2837 = vmatpush3.bf16.msra.mxu1 %v2836_v36  ;;  %v916_v36 = vcombine.low %v602_v21, %v609_v22  ;;  %v1017_v57 = vcombine.low %v1009_v47, %v1016_v51  ;;  %v627_v21 = vrot.slane %v626_v7, 2  ;;  %v2888_v51 = vpack.c.bf16 %v1249_v35, %v1248_v34  ;;  %v1273_v34 = vld [vmem:[#allocation15 + $0x3d8] sm:$0xff] }
 0x193   :  { %2839 = vmatprep.subr.bf16.mxu1 %v2838_v49  ;;  %v521_v49 = vld [vmem:[#allocation7 + $0x28] sm:$0xff] }
 0x194   :  { %v924_v44 = vrot.slane %v916_v36, %v3550_v39  ;;  %v631_v60 = vadd.f32 %v541_v55, %v521_v49  ;;  %v1090_v63 = vrot.slane %v1017_v57, 7  ;;  %v582_v36 = vld [vmem:[#allocation7 + $0x210] sm:$0xff]  ;;  %v628_v42 = vadd.f32 %v627_v21, %v626_v7 }
 0x195   :  { %v1250_v55 = vld [vmem:[#allocation15 + $0x320] sm:$0xff] }
 0x196   :  { %2841 = vmatpush3.bf16.msra.mxu1 %v2840_v50  ;;  %v522_v50 = vld [vmem:[#allocation7 + $0x30] sm:$0xff]  ;;  %v932_v53 = vcombine.low %v924_v44, %v931_v45  ;;  %v632_v2 = vrot.slane %v631_v60, 4  ;;  %v766_v44 = vadd.f32 %v765_v27, %v764_v12  ;;  %v2886_v45 = vpack.c.bf16 %v1265_v30, %v1264_v29 }
 0x197   :  { %2843 = vmatprep.subr.bf16.mxu1 %v2842_v5  ;;  %v638_v61 = vadd.f32 %v542_v56, %v522_v50  ;;  %v646_v5 = vrot.slane %v645_v62, 4  ;;  %v778_v50 = vadd.f32 %v582_v36, %v562_v24  ;;  %v1251_v56 = vld [vmem:[#allocation15 + $0x328] sm:$0xff]  ;;  %v629_v57 = vrot.slane %v628_v42, 1  ;;  %v1254_v30 = vld [vmem:[#allocation15 + $0x340] sm:$0xff] }
 0x198   :  { %v633_v8 = vadd.f32 %v632_v2, %v631_v60  ;;  %v767_v49 = vrot.slane %v766_v44, 2  ;;  %v786_v2 = vrot.slane %v785_v54, 4 }
 0x199   :  { %v639_v4 = vrot.slane %v638_v61, 4  ;;  %v647_v11 = vadd.f32 %v646_v5, %v645_v62  ;;  %v779_v60 = vrot.slane %v778_v50, 4  ;;  %v1269_v62 = vld [vmem:[#allocation15 + $0x3b8] sm:$0xff] }
 0x19a   :  { %2845 = vmatpush3.bf16.msra.mxu1 %v2844_v6  ;;  %v1092_v6 = vsel %vm1091_vm2, %v1090_v63, %v932_v53  ;;  %v634_v22 = vrot.slane %v633_v8, 2  ;;  %v772_v53 = vrot.slane %v771_v48, 4  ;;  %v768_v59 = vadd.f32 %v767_v49, %v766_v44 }
 0x19b   :  { %2847 = vmatprep.subr.bf16.mxu1 %v2846_v25  ;;  %v1094_v9 = vsel %vm1093_vm3, %v1090_v63, %v1092_v6  ;;  %v640_v10 = vadd.f32 %v639_v4, %v638_v61  ;;  %v1268_v61 = vld [vmem:[#allocation15 + $0x3b0] sm:$0xff]  ;;  %v780_v3 = vadd.f32 %v779_v60, %v778_v50  ;;  %v2892_v4 = vpack.c.bf16 %v1251_v56, %v1250_v55  ;;  %v1275_v55 = vld [vmem:[#allocation15 + $0x3e8] sm:$0xff] }
 0x19c   :  { %v1096_v13 = vsel %vm1095_vm4, %v1090_v63, %v1094_v9  ;;  %v635_v43 = vadd.f32 %v634_v22, %v633_v8  ;;  %v773_v1 = vadd.f32 %v772_v53, %v771_v48  ;;  %v769_v5 = vrot.slane %v768_v59, 1  ;;  %v1252_v9 = vld [vmem:[#allocation15 + $0x330] sm:$0xff]  ;;  %v526_v53 = vld [vmem:[#allocation7 + $0x50] sm:$0xff] }
 0x19d   :  { %v3560_v14 = vsel %vm1097_vm5, %v1090_v63, %v1096_v13  ;;  %v641_v25 = vrot.slane %v640_v10, 2  ;;  %v787_v7 = vadd.f32 %v786_v2, %v785_v54  ;;  %v2894_v8 = vpack.c.bf16 %v1269_v62, %v1268_v61  ;;  %v1253_v13 = vld [vmem:[#allocation15 + $0x338] sm:$0xff]  ;;  %v1274_v54 = vld [vmem:[#allocation15 + $0x3e0] sm:$0xff]  ;;  %v527_v56 = vld [vmem:[#allocation7 + $0x58] sm:$0xff] }
 0x19e   :  { %2849 = vmatpush3.bf16.msra.mxu1 %v2848_v26  ;;  %v1476_v17 = vcombine.high %v3560_v14, %v3560_v14  ;;  %v648_v26 = vrot.slane %v647_v11, 2  ;;  %v636_v58 = vrot.slane %v635_v43, 1  ;;  %v774_v6 = vrot.slane %v773_v1, 2  ;;  %v546_v60 = vld [vmem:[#allocation7 + $0xf0] sm:$0xff]  ;;  %v547_v62 = vld [vmem:[#allocation7 + $0xf8] sm:$0xff] }
 0x19f   :  { %2883 = vmatprep.subr.bf16.mxu1 %v2882_v38  ;;  %v1266_v38 = vld [vmem:[#allocation15 + $0x3a0] sm:$0xff]  ;;  %v642_v46 = vadd.f32 %v641_v25, %v640_v10  ;;  %v630_v10 = vadd.f32 %v629_v57, %v628_v42  ;;  %v781_v12 = vrot.slane %v780_v3, 2  ;;  %v788_v23 = vrot.slane %v787_v7, 2 }
 0x1a0   :  { %v1490_v28 = vrot.slane %v1476_v17, %v3550_v39  ;;  %v649_v47 = vadd.f32 %v648_v26, %v647_v11  ;;  %v2890_v52 = vpack.c.bf16 %v1267_v40, %v1266_v38  ;;  %v637_v11 = vadd.f32 %v636_v58, %v635_v43  ;;  %v1270_v17 = vld [vmem:[#allocation15 + $0x3c0] sm:$0xff]  ;;  %v544_v58 = vld [vmem:[#allocation7 + $0xe0] sm:$0xff] }
 0x1a1   :  { %v643_v63 = vrot.slane %v642_v46, 1  ;;  %v775_v22 = vadd.f32 %v774_v6, %v773_v1  ;;  %v782_v24 = vadd.f32 %v781_v12, %v780_v3  ;;  %v770_v25 = vadd.f32 %v769_v5, %v768_v59  ;;  %v545_v59 = vld [vmem:[#allocation7 + $0xe8] sm:$0xff] }
 0x1a2   :  { %v1492_v37 = vcombine.high %v1490_v28, %v1490_v28  ;;  %v650_v0 = vrot.slane %v649_v47, 1  ;;  %v789_v27 = vadd.f32 %v788_v23, %v787_v7  ;;  %v2898_v29 = vpack.c.bf16 %v1271_v19, %v1270_v17  ;;  %v1258_v3 = vld [vmem:[#allocation15 + $0x360] sm:$0xff] }
 0x1a3   :  { %v644_v20 = vadd.f32 %v643_v63, %v642_v46  ;;  %v776_v26 = vrot.slane %v775_v22, 1  ;;  %v783_v31 = vrot.slane %v782_v24, 1  ;;  %v2900_v43 = vpack.c.bf16 %v1255_v32, %v1254_v30  ;;  %v1257_v46 = vld [vmem:[#allocation15 + $0x358] sm:$0xff] }
 0x1a4   :  { %1715 = vmatprep.mubr.f32.mxu1 %v1492_v37  ;;  %v651_v21 = vadd.f32 %v650_v0, %v649_v47  ;;  %v790_v36 = vrot.slane %v789_v27, 1  ;;  %v933_v37 = vcombine.low %v630_v10, %v637_v11  ;;  %v666_v1 = vadd.f32 %v546_v60, %v526_v53  ;;  %v565_v30 = vld [vmem:[#allocation7 + $0x188] sm:$0xff]  ;;  %v586_v53 = vld [vmem:[#allocation7 + $0x230] sm:$0xff] }
 0x1a5   :  { %1716 = vmatmul.mubr.f32.vlgmr.msra.gmra.mrb[2].mxu1 %v1490_v28  ;;  %v2896_v28 = vpack.c.bf16 %v1253_v13, %v1252_v9  ;;  %v777_v35 = vadd.f32 %v776_v26, %v775_v22  ;;  %v784_v40 = vadd.f32 %v783_v31, %v782_v24  ;;  %v2906_v2 = vpack.c.bf16 %v1275_v55, %v1274_v54  ;;  %v1277_v9 = vld [vmem:[#allocation15 + $0x3f8] sm:$0xff]  ;;  %v1327_v26 = vld [vmem:[#allocation15 + $0x588] sm:$0xff]  ;;  %v1312_v55 = vld [vmem:[#allocation15 + $0x510] sm:$0xff] }
 0x1a6   :  { %2885 = vmatpush3.bf16.msra.mxu1 %v2884_v33  ;;  %v1272_v33 = vld [vmem:[#allocation15 + $0x3d0] sm:$0xff]  ;;  %v934_v38 = vcombine.low %v644_v20, %v651_v21  ;;  %v791_v41 = vadd.f32 %v790_v36, %v789_v27  ;;  %v941_v47 = vrot.slane %v933_v37, %v3550_v39  ;;  %v673_v7 = vadd.f32 %v547_v62, %v527_v56  ;;  %v1261_v21 = vld [vmem:[#allocation15 + $0x378] sm:$0xff]  ;;  %v1330_v60 = vld [vmem:[#allocation15 + $0x5a0] sm:$0xff] }
 0x1a7   :  { %2887 = vmatprep.subr.bf16.mxu1 %v2886_v45  ;;  %v1018_v42 = vcombine.low %v770_v25, %v777_v35  ;;  %v2902_v44 = vpack.c.bf16 %v1273_v34, %v1272_v33  ;;  %v1256_v45 = vld [vmem:[#allocation15 + $0x350] sm:$0xff]  ;;  %v667_v12 = vrot.slane %v666_v1, 4  ;;  %v1326_v25 = vld [vmem:[#allocation15 + $0x580] sm:$0xff]  ;;  %v1313_v56 = vld [vmem:[#allocation15 + $0x518] sm:$0xff] }
 0x1a8   :  { %v948_v48 = vrot.slane %v934_v38, %v3550_v39  ;;  %v1019_v49 = vcombine.low %v784_v40, %v791_v41  ;;  %v2904_v61 = vpack.c.bf16 %v1257_v46, %v1256_v45  ;;  %v674_v17 = vrot.slane %v673_v7, 4  ;;  %v1260_v20 = vld [vmem:[#allocation15 + $0x370] sm:$0xff]  ;;  %v585_v32 = vld [vmem:[#allocation7 + $0x228] sm:$0xff] }
 0x1a9   :  { %v1026_v50 = vrot.slane %v1018_v42, %v3550_v39  ;;  %v564_v27 = vld [vmem:[#allocation7 + $0x180] sm:$0xff]  ;;  %v668_v33 = vadd.f32 %v667_v12, %v666_v1  ;;  %v2912_v36 = vpack.c.bf16 %v1261_v21, %v1260_v20  ;;  %v2946_v38 = vpack.c.bf16 %v1327_v26, %v1326_v25  ;;  %v1310_v42 = vld [vmem:[#allocation15 + $0x500] sm:$0xff]  ;;  %v587_v62 = vld [vmem:[#allocation7 + $0x238] sm:$0xff] }
 0x1aa   :  { %2889 = vmatpush3.bf16.msra.mxu1 %v2888_v51  ;;  %v524_v51 = vld [vmem:[#allocation7 + $0x40] sm:$0xff]  ;;  %v1033_v57 = vrot.slane %v1019_v49, %v3550_v39  ;;  %v949_v5 = vcombine.low %v941_v47, %v948_v48  ;;  %v675_v34 = vadd.f32 %v674_v17, %v673_v7  ;;  %v799_v46 = vadd.f32 %v585_v32, %v565_v30  ;;  %v566_v47 = vld [vmem:[#allocation7 + $0x190] sm:$0xff] }
 0x1ab   :  { %2891 = vmatprep.subr.bf16.mxu1 %v2890_v52  ;;  %v525_v52 = vld [vmem:[#allocation7 + $0x48] sm:$0xff]  ;;  %v652_v63 = vadd.f32 %v544_v58, %v524_v51  ;;  %v584_v31 = vld [vmem:[#allocation7 + $0x220] sm:$0xff]  ;;  %v669_v48 = vrot.slane %v668_v33, 2 }
 0x1ac   :  { %v659_v0 = vadd.f32 %v545_v59, %v525_v52  ;;  %v1034_v6 = vcombine.low %v1026_v50, %v1033_v57  ;;  %v792_v45 = vadd.f32 %v584_v31, %v564_v27  ;;  %v676_v49 = vrot.slane %v675_v34, 2  ;;  %v1328_v51 = vld [vmem:[#allocation15 + $0x590] sm:$0xff]  ;;  %v1329_v52 = vld [vmem:[#allocation15 + $0x598] sm:$0xff] }
 0x1ad   :  { %v653_v10 = vrot.slane %v652_v63, 4  ;;  %v567_v57 = vld [vmem:[#allocation7 + $0x198] sm:$0xff]  ;;  %v800_v1 = vrot.slane %v799_v46, 4 }
 0x1ae   :  { %2893 = vmatpush3.bf16.msra.mxu1 %v2892_v4  ;;  %v1259_v4 = vld [vmem:[#allocation15 + $0x368] sm:$0xff]  ;;  %v660_v11 = vrot.slane %v659_v0, 4  ;;  %v1101_v13 = vrot.slane %v1034_v6, 7  ;;  %v1332_v17 = vld [vmem:[#allocation15 + $0x5b0] sm:$0xff] }
 0x1af   :  { %2895 = vmatprep.subr.bf16.mxu1 %v2894_v8  ;;  %v1276_v8 = vld [vmem:[#allocation15 + $0x3f0] sm:$0xff]  ;;  %v2908_v19 = vpack.c.bf16 %v1259_v4, %v1258_v3  ;;  %v654_v22 = vadd.f32 %v653_v10, %v652_v63  ;;  %v670_v3 = vadd.f32 %v669_v48, %v668_v33  ;;  %v677_v4 = vadd.f32 %v676_v49, %v675_v34  ;;  %v1314_v10 = vld [vmem:[#allocation15 + $0x520] sm:$0xff] }
 0x1b0   :  { %v2910_v23 = vpack.c.bf16 %v1277_v9, %v1276_v8  ;;  %v1102_v24 = vsel %vm1091_vm2, %v1101_v13, %v949_v5  ;;  %v806_v5 = vadd.f32 %v586_v53, %v566_v47  ;;  %v801_v7 = vadd.f32 %v800_v1, %v799_v46  ;;  %v1316_v34 = vld [vmem:[#allocation15 + $0x530] sm:$0xff] }
 0x1b1   :  { %v655_v40 = vrot.slane %v654_v22, 2  ;;  %v2952_v8 = vpack.c.bf16 %v1313_v56, %v1312_v55  ;;  %v678_v25 = vrot.slane %v677_v4, 1  ;;  %v1319_v56 = vld [vmem:[#allocation15 + $0x548] sm:$0xff] }
 0x1b2   :  { %2897 = vmatpush3.bf16.msra.mxu1 %v2896_v28  ;;  %v661_v28 = vadd.f32 %v660_v11, %v659_v0  ;;  %v793_v0 = vrot.slane %v792_v45, 4  ;;  %v1315_v11 = vld [vmem:[#allocation15 + $0x528] sm:$0xff]  ;;  %v807_v12 = vrot.slane %v806_v5, 4 }
 0x1b3   :  { %2899 = vmatprep.subr.bf16.mxu1 %v2898_v29  ;;  %v1103_v29 = vsel %vm1093_vm3, %v1101_v13, %v1102_v24  ;;  %v656_v58 = vadd.f32 %v655_v40, %v654_v22  ;;  %v671_v24 = vrot.slane %v670_v3, 1  ;;  %v2956_v30 = vpack.c.bf16 %v1315_v11, %v1314_v10 }
 0x1b4   :  { %v1104_v35 = vsel %vm1095_vm4, %v1101_v13, %v1103_v29  ;;  %v794_v6 = vadd.f32 %v793_v0, %v792_v45  ;;  %v808_v26 = vadd.f32 %v807_v12, %v806_v5  ;;  %v679_v45 = vadd.f32 %v678_v25, %v677_v4  ;;  %v1321_v0 = vld [vmem:[#allocation15 + $0x558] sm:$0xff] }
 0x1b5   :  { %v3573_v37 = vsel %vm1097_vm5, %v1101_v13, %v1104_v35  ;;  %v813_v13 = vadd.f32 %v587_v62, %v567_v57  ;;  %v657_v20 = vrot.slane %v656_v58, 1  ;;  %v1336_v57 = vld [vmem:[#allocation15 + $0x5d0] sm:$0xff]  ;;  %v529_v5 = vld [vmem:[#allocation7 + $0x68] sm:$0xff] }
 0x1b6   :  { %2901 = vmatpush3.bf16.msra.mxu1 %v2900_v43  ;;  %v1493_v41 = vcombine.high %v3573_v37, %v3573_v37  ;;  %v1311_v43 = vld [vmem:[#allocation15 + $0x508] sm:$0xff]  ;;  %v795_v22 = vrot.slane %v794_v6, 2  ;;  %v809_v32 = vrot.slane %v808_v26, 2  ;;  %v528_v4 = vld [vmem:[#allocation7 + $0x60] sm:$0xff] }
 0x1b7   :  { %2903 = vmatprep.subr.bf16.mxu1 %v2902_v44  ;;  %v662_v44 = vrot.slane %v661_v28, 2  ;;  %v2948_v54 = vpack.c.bf16 %v1311_v43, %v1310_v42  ;;  %v814_v27 = vrot.slane %v813_v13, 4  ;;  %v658_v35 = vadd.f32 %v657_v20, %v656_v58  ;;  %v1334_v42 = vld [vmem:[#allocation15 + $0x5c0] sm:$0xff]  ;;  %v1335_v43 = vld [vmem:[#allocation15 + $0x5c8] sm:$0xff]  ;;  %v1337_v58 = vld [vmem:[#allocation15 + $0x5d8] sm:$0xff] }
 0x1b8   :  { %v1507_v50 = vrot.slane %v1493_v41, %v3550_v39  ;;  %v1317_v41 = vld [vmem:[#allocation15 + $0x538] sm:$0xff]  ;;  %v810_v46 = vadd.f32 %v809_v32, %v808_v26  ;;  %v2962_v53 = vpack.c.bf16 %v1335_v43, %v1334_v42  ;;  %v550_v20 = vld [vmem:[#allocation7 + $0x110] sm:$0xff] }
 0x1b9   :  { %v663_v63 = vadd.f32 %v662_v44, %v661_v28  ;;  %v796_v28 = vadd.f32 %v795_v22, %v794_v6  ;;  %v815_v33 = vadd.f32 %v814_v27, %v813_v13  ;;  %v672_v44 = vadd.f32 %v671_v24, %v670_v3  ;;  %v530_v6 = vld [vmem:[#allocation7 + $0x70] sm:$0xff]  ;;  %v531_v13 = vld [vmem:[#allocation7 + $0x78] sm:$0xff] }
 0x1ba   :  { %2905 = vmatpush3.bf16.msra.mxu1 %v2904_v61  ;;  %v1509_v59 = vcombine.high %v1507_v50, %v1507_v50  ;;  %v1331_v61 = vld [vmem:[#allocation15 + $0x5a8] sm:$0xff]  ;;  %v2966_v3 = vpack.c.bf16 %v1337_v58, %v1336_v57  ;;  %v694_v25 = vadd.f32 %v550_v20, %v530_v6  ;;  %v569_v57 = vld [vmem:[#allocation7 + $0x1a8] sm:$0xff]  ;;  %v3592_v6 = vld [vmem:[#allocation15 + $0x90] sm:$0xff] }
 0x1bb   :  { %2907 = vmatprep.subr.bf16.mxu1 %v2906_v2  ;;  %v2950_v2 = vpack.c.bf16 %v1329_v52, %v1328_v51  ;;  %v2954_v9 = vpack.c.bf16 %v1331_v61, %v1330_v60  ;;  %v664_v21 = vrot.slane %v663_v63, 1  ;;  %v816_v47 = vrot.slane %v815_v33, 2  ;;  %v551_v22 = vld [vmem:[#allocation7 + $0x118] sm:$0xff]  ;;  %v589_v58 = vld [vmem:[#allocation7 + $0x248] sm:$0xff] }
 0x1bc   :  { %1855 = vmatprep.mubr.f32.mxu1 %v1509_v59  ;;  %v2960_v52 = vpack.c.bf16 %v1317_v41, %v1316_v34  ;;  %v951_v61 = vcombine.low %v672_v44, %v679_v45  ;;  %v695_v41 = vrot.slane %v694_v25, 4 }
 0x1bd   :  { %v817_v51 = vadd.f32 %v816_v47, %v815_v33  ;;  %v568_v33 = vld [vmem:[#allocation7 + $0x1a0] sm:$0xff] }
 0x1be   :  { %2909 = vmatpush3.bf16.msra.mxu1 %v2908_v19  ;;  %v1333_v19 = vld [vmem:[#allocation15 + $0x5b8] sm:$0xff]  ;;  %v965_v10 = vrot.slane %v951_v61, %v3550_v39  ;;  %v696_v47 = vadd.f32 %v695_v41, %v694_v25 }
 0x1bf   :  { %2911 = vmatprep.subr.bf16.mxu1 %v2910_v23  ;;  %v802_v23 = vrot.slane %v801_v7, 2  ;;  %v2958_v31 = vpack.c.bf16 %v1333_v19, %v1332_v17  ;;  %v818_v60 = vrot.slane %v817_v51, 1  ;;  %v548_v17 = vld [vmem:[#allocation7 + $0x100] sm:$0xff]  ;;  %v549_v19 = vld [vmem:[#allocation7 + $0x108] sm:$0xff] }
 0x1c0   :  { %v687_v24 = vadd.f32 %v549_v19, %v529_v5  ;;  %v3590_v5 = vld [vmem:[#allocation15 + $0x8] sm:$0xff] }
 0x1c1   :  { %v803_v29 = vadd.f32 %v802_v23, %v801_v7  ;;  %v819_v1 = vadd.f32 %v818_v60, %v817_v51  ;;  %v1338_v7 = vld [vmem:[#allocation15 + $0x5e0] sm:$0xff]  ;;  %v680_v23 = vadd.f32 %v548_v17, %v528_v4  ;;  %v1324_v51 = vld [vmem:[#allocation15 + $0x570] sm:$0xff]  ;;  %v316_v60 = vld [vmem:[#allocation13] sm:$0x3] }
 0x1c2   :  { %2913 = vmatpush3.bf16.msra.mxu1 %v2912_v36  ;;  %v665_v36 = vadd.f32 %v664_v21, %v663_v63  ;;  %v1320_v63 = vld [vmem:[#allocation15 + $0x550] sm:$0xff]  ;;  %v1375_v17 = vld [vmem:[#allocation15 + $0x708] sm:$0xff] }
 0x1c3   :  { %2947 = vmatprep.subr.bf16.mxu1 %v2946_v38  ;;  %v797_v38 = vrot.slane %v796_v28, 1  ;;  %v804_v40 = vrot.slane %v803_v29, 1  ;;  %v2968_v26 = vpack.c.bf16 %v1321_v0, %v1320_v63  ;;  %v681_v34 = vrot.slane %v680_v23, 4  ;;  %v3585_v0 = vld [vmem:[#allocation15] sm:$0xff] }
 0x1c4   :  { %v950_v55 = vcombine.low %v658_v35, %v665_v36  ;;  %v688_v35 = vrot.slane %v687_v24, 4  ;;  %v1340_v36 = vld [vmem:[#allocation15 + $0x5f0] sm:$0xff]  ;;  %v697_v63 = vrot.slane %v696_v47, 2  ;;  %v570_v19 = vld [vmem:[#allocation7 + $0x1b0] sm:$0xff] }
 0x1c5   :  { %1856 = vmatmul.mubr.f32.vlgmr.msra.gmra.mrb[4].mxu1 %v1507_v50  ;;  %v798_v48 = vadd.f32 %v797_v38, %v796_v28  ;;  %v805_v49 = vadd.f32 %v804_v40, %v803_v29  ;;  %v811_v50 = vrot.slane %v810_v46, 1  ;;  %v701_v28 = vadd.f32 %v551_v22, %v531_v13  ;;  %v1322_v29 = vld [vmem:[#allocation15 + $0x560] sm:$0xff]  ;;  %v1341_v38 = vld [vmem:[#allocation15 + $0x5f8] sm:$0xff] }
 0x1c6   :  { %2949 = vmatpush3.bf16.msra.mxu1 %v2948_v54  ;;  %v1318_v54 = vld [vmem:[#allocation15 + $0x540] sm:$0xff]  ;;  %v588_v40 = vld [vmem:[#allocation7 + $0x240] sm:$0xff]  ;;  %v682_v44 = vadd.f32 %v681_v34, %v680_v23  ;;  %v689_v45 = vadd.f32 %v688_v35, %v687_v24 }
 0x1c7   :  { %2951 = vmatprep.subr.bf16.mxu1 %v2950_v2  ;;  %v812_v59 = vadd.f32 %v811_v50, %v810_v46  ;;  %v1035_v62 = vcombine.low %v798_v48, %v805_v49  ;;  %v2964_v2 = vpack.c.bf16 %v1319_v56, %v1318_v54  ;;  %v702_v42 = vrot.slane %v701_v28, 4  ;;  %v1390_v54 = vld [vmem:[#allocation15 + $0x780] sm:$0xff]  ;;  %v1391_v56 = vld [vmem:[#allocation15 + $0x788] sm:$0xff]  ;;  %v1393_v23 = vld [vmem:[#allocation15 + $0x798] sm:$0xff] }
 0x1c8   :  { %v820_v49 = vadd.f32 %v588_v40, %v568_v33  ;;  %v2974_v50 = vpack.c.bf16 %v1341_v38, %v1340_v36  ;;  %v1374_v13 = vld [vmem:[#allocation15 + $0x700] sm:$0xff]  ;;  %v1376_v35 = vld [vmem:[#allocation15 + $0x710] sm:$0xff]  ;;  %v1377_v36 = vld [vmem:[#allocation15 + $0x718] sm:$0xff] }
 0x1c9   :  { %v1036_v11 = vcombine.low %v812_v59, %v819_v1  ;;  %v1043_v12 = vrot.slane %v1035_v62, %v3550_v39  ;;  %v703_v48 = vadd.f32 %v702_v42, %v701_v28  ;;  %v683_v59 = vrot.slane %v682_v44, 2  ;;  %v590_v24 = vld [vmem:[#allocation7 + $0x250] sm:$0xff]  ;;  %v571_v28 = vld [vmem:[#allocation7 + $0x1b8] sm:$0xff] }
 0x1ca   :  { %2953 = vmatpush3.bf16.msra.mxu1 %v2952_v8  ;;  %v1339_v8 = vld [vmem:[#allocation15 + $0x5e8] sm:$0xff]  ;;  %v690_v62 = vrot.slane %v689_v45, 2  ;;  %v821_v4 = vrot.slane %v820_v49, 4  ;;  %v1394_v38 = vld [vmem:[#allocation15 + $0x7a0] sm:$0xff]  ;;  %v834_v42 = vadd.f32 %v590_v24, %v570_v19  ;;  %v1381_v24 = vld [vmem:[#allocation15 + $0x738] sm:$0xff] }
 0x1cb   :  { %2955 = vmatprep.subr.bf16.mxu1 %v2954_v9  ;;  %v958_v9 = vrot.slane %v950_v55, %v3550_v39  ;;  %v1050_v21 = vrot.slane %v1036_v11, %v3550_v39  ;;  %v2970_v27 = vpack.c.bf16 %v1339_v8, %v1338_v7  ;;  %v3594_v7 = vld [vmem:[#allocation15 + $0x98] sm:$0xff]  ;;  %v3598_v8 = vrot.slane %v3560_v14, %v3550_v39  ;;  %v1392_v14 = vld [vmem:[#allocation15 + $0x790] sm:$0xff]  ;;  %v1170_v19 = vld [vmem:[#allocation15 + $0xa0] sm:$0xff] }
 0x1cc   :  { %v827_v11 = vadd.f32 %v589_v58, %v569_v57  ;;  %v684_v20 = vadd.f32 %v683_v59, %v682_v44  ;;  %v691_v25 = vadd.f32 %v690_v62, %v689_v45  ;;  %v3014_v34 = vpack.c.bf16 %v1393_v23, %v1392_v14  ;;  %v1395_v44 = vld [vmem:[#allocation15 + $0x7a8] sm:$0xff]  ;;  %v3613_v45 = vld [vmem:[#allocation15 + $0x720] sm:$0xff] }
 0x1cd   :  { %v1051_v32 = vcombine.low %v1043_v12, %v1050_v21  ;;  %v321_v12 = vrot.slane %v316_v60, %v160_v16  ;;  %v325_v21 = vrot.slane %v316_v60, %v164_v18  ;;  %v2790_v16 = vpack.c.bf16 %v3594_v7, %v3592_v6  ;;  %v1152_v60 = vld [vmem:[#allocation15 + $0x10] sm:$0xff]  ;;  %v1171_v23 = vld [vmem:[#allocation15 + $0xa8] sm:$0xff]  ;;  %v1157_v6 = vld [vmem:[#allocation15 + $0x38] sm:$0xff] }
 0x1ce   :  { %2957 = vmatpush3.bf16.msra.mxu1 %v2956_v30  ;;  %v1323_v30 = vld [vmem:[#allocation15 + $0x568] sm:$0xff]  ;;  %v1491_v15 = vcombine.high %v3598_v8, %v3598_v8  ;;  %v828_v33 = vrot.slane %v827_v11, 4  ;;  %v685_v40 = vrot.slane %v684_v20, 1  ;;  %v3016_v57 = vpack.c.bf16 %v1377_v36, %v1376_v35 }
 0x1cf   :  { %2959 = vmatprep.subr.bf16.mxu1 %v2958_v31  ;;  %v966_v31 = vcombine.low %v958_v9, %v965_v10  ;;  %v1108_v43 = vrot.slane %v1051_v32, 7  ;;  %v2972_v46 = vpack.c.bf16 %v1323_v30, %v1322_v29  ;;  %v3010_v10 = vpack.c.bf16 %v1391_v56, %v1390_v54  ;;  %v591_v29 = vld [vmem:[#allocation7 + $0x258] sm:$0xff] }
 0x1d0   :  { %v3012_v32 = vpack.c.bf16 %v1375_v17, %v1374_v13 }
 0x1d2   :  { %2961 = vmatpush3.bf16.msra.mxu1 %v2960_v52  ;;  %v1325_v52 = vld [vmem:[#allocation15 + $0x578] sm:$0xff] }
 0x1d3   :  { %2963 = vmatprep.subr.bf16.mxu1 %v2962_v53  ;;  %v1109_v53 = vsel %vm1091_vm2, %v1108_v43, %v966_v31  ;;  %v2976_v1 = vpack.c.bf16 %v1325_v52, %v1324_v51  ;;  %v822_v31 = vadd.f32 %v821_v4, %v820_v49  ;;  %v829_v49 = vadd.f32 %v828_v33, %v827_v11  ;;  %v1153_v4 = vld [vmem:[#allocation15 + $0x18] sm:$0xff] }
 0x1d4   :  { %v1110_v55 = vsel %vm1093_vm3, %v1108_v43, %v1109_v53 }
 0x1d5   :  { %v1111_v61 = vsel %vm1095_vm4, %v1108_v43, %v1110_v55  ;;  %v823_v41 = vrot.slane %v822_v31, 2  ;;  %v835_v55 = vrot.slane %v834_v42, 4  ;;  %v830_v58 = vrot.slane %v829_v49, 2 }
 0x1d6   :  { %2965 = vmatpush3.bf16.msra.mxu1 %v2964_v2  ;;  %v3588_v2 = vsel %vm1097_vm5, %v1108_v43, %v1111_v61  ;;  %v3018_v61 = vpack.c.bf16 %v1395_v44, %v1394_v38  ;;  %v2794_v38 = vpack.c.bf16 %v1171_v23, %v1170_v19 }
 0x1d7   :  { %2967 = vmatprep.subr.bf16.mxu1 %v2966_v3  ;;  %v704_v3 = vrot.slane %v703_v48, 2  ;;  %v1510_v9 = vcombine.high %v3588_v2, %v3588_v2  ;;  %v824_v54 = vadd.f32 %v823_v41, %v822_v31  ;;  %v831_v11 = vadd.f32 %v830_v58, %v829_v49  ;;  %v1172_v41 = vld [vmem:[#allocation15 + $0xb0] sm:$0xff]  ;;  %v3634_v49 = vld [vmem:[#allocation15 + $0xc0] sm:$0xff] }
 0x1d8   :  { %v534_v58 = vld [vmem:[#allocation7 + $0x90] sm:$0xff] }
 0x1d9   :  { %v1524_v22 = vrot.slane %v1510_v9, %v3550_v39  ;;  %v705_v30 = vadd.f32 %v704_v3, %v703_v48  ;;  %v1396_v9 = vld [vmem:[#allocation15 + $0x7b0] sm:$0xff] }
 0x1da   :  { %2969 = vmatpush3.bf16.msra.mxu1 %v2968_v26  ;;  %v698_v26 = vadd.f32 %v697_v63, %v696_v47  ;;  %v692_v47 = vrot.slane %v691_v25, 1  ;;  %v3616_v63 = vadd.f32 %v685_v40, %v684_v20  ;;  %v1380_v20 = vld [vmem:[#allocation15 + $0x730] sm:$0xff]  ;;  %v1155_v40 = vld [vmem:[#allocation15 + $0x28] sm:$0xff] }
 0x1db   :  { %2971 = vmatprep.subr.bf16.mxu1 %v2970_v27  ;;  %v2788_v27 = vpack.c.bf16 %v3590_v5, %v3585_v0  ;;  %v1526_v18 = vcombine.high %v1524_v22, %v1524_v22  ;;  %v706_v53 = vrot.slane %v705_v30, 1  ;;  %v3024_v0 = vpack.c.bf16 %v1381_v24, %v1380_v20 }
 0x1dc   :  { %v699_v48 = vrot.slane %v698_v26, 1 }
 0x1dd   :  { %1995 = vmatprep.mubr.f32.mxu1 %v1526_v18  ;;  %v707_v14 = vadd.f32 %v706_v53, %v705_v30  ;;  %v1399_v30 = vld [vmem:[#allocation15 + $0x7c8] sm:$0xff] }
 0x1de   :  { %2973 = vmatpush3.bf16.msra.mxu1 %v2972_v46  ;;  %v1379_v46 = vld [vmem:[#allocation15 + $0x728] sm:$0xff] }
 0x1df   :  { %2975 = vmatprep.subr.bf16.mxu1 %v2974_v50  ;;  %v841_v50 = vadd.f32 %v591_v29, %v571_v28  ;;  %v3020_v62 = vpack.c.bf16 %v1379_v46, %v3613_v45  ;;  %v832_v29 = vrot.slane %v831_v11, 1 }
 0x1e1   :  { %v842_v59 = vrot.slane %v841_v50, 4 }
 0x1e2   :  { %2977 = vmatpush3.bf16.msra.mxu1 %v2976_v1  ;;  %v825_v1 = vrot.slane %v824_v54, 1 }
 0x1e3   :  { %3011 = vmatprep.subr.bf16.mxu1 %v3010_v10  ;;  %v1397_v10 = vld [vmem:[#allocation15 + $0x7b8] sm:$0xff]  ;;  %v843_v13 = vadd.f32 %v842_v59, %v841_v50  ;;  %v1400_v50 = vld [vmem:[#allocation15 + $0x7d0] sm:$0xff] }
 0x1e4   :  { %v826_v28 = vadd.f32 %v825_v1, %v824_v54  ;;  %v3022_v33 = vpack.c.bf16 %v1397_v10, %v1396_v9  ;;  %v552_v54 = vld [vmem:[#allocation7 + $0x120] sm:$0xff]  ;;  %v535_v59 = vld [vmem:[#allocation7 + $0x98] sm:$0xff] }
 0x1e5   :  { %1996 = vmatmul.mubr.f32.vlgmr.msra.gmra.mrb[6].mxu1 %v1524_v22  ;;  %v3620_v22 = vadd.f32 %v699_v48, %v698_v26  ;;  %v844_v18 = vrot.slane %v843_v13, 2  ;;  %v1398_v26 = vld [vmem:[#allocation15 + $0x7c0] sm:$0xff]  ;;  %v1156_v48 = vld [vmem:[#allocation15 + $0x30] sm:$0xff] }
 0x1e6   :  { %3013 = vmatpush3.bf16.msra.mxu1 %v3012_v32  ;;  %v2792_v32 = vpack.c.bf16 %v1153_v4, %v1152_v60  ;;  %v3026_v7 = vpack.c.bf16 %v1399_v30, %v1398_v26  ;;  %v2800_v10 = vpack.c.bf16 %v1157_v6, %v1156_v48  ;;  %v3643_v26 = vld [vmem:[#allocation15 + $0x58] sm:$0xff]  ;;  %v1179_v48 = vld [vmem:[#allocation15 + $0xe8] sm:$0xff] }
 0x1e7   :  { %3015 = vmatprep.subr.bf16.mxu1 %v3014_v34  ;;  %v833_v34 = vadd.f32 %v832_v29, %v831_v11  ;;  %v845_v36 = vadd.f32 %v844_v18, %v843_v13  ;;  %v968_v45 = vcombine.low %v3620_v22, %v707_v14  ;;  %v554_v13 = vld [vmem:[#allocation7 + $0x130] sm:$0xff]  ;;  %v1176_v18 = vld [vmem:[#allocation15 + $0xd0] sm:$0xff]  ;;  %v573_v6 = vld [vmem:[#allocation7 + $0x1c8] sm:$0xff] }
 0x1e8   :  { %v1402_v22 = vld [vmem:[#allocation15 + $0x7e0] sm:$0xff]  ;;  %v1403_v14 = vld [vmem:[#allocation15 + $0x7e8] sm:$0xff]  ;;  %v722_v24 = vadd.f32 %v554_v13, %v534_v58  ;;  %v3658_v58 = vld [vmem:[#allocation15 + $0xf8] sm:$0xff] }
 0x1e9   :  { %v846_v44 = vrot.slane %v845_v36, 1  ;;  %v1052_v46 = vcombine.low %v826_v28, %v833_v34 }
 0x1ea   :  { %3017 = vmatpush3.bf16.msra.mxu1 %v3016_v57  ;;  %v533_v57 = vld [vmem:[#allocation7 + $0x88] sm:$0xff] }
 0x1eb   :  { %3019 = vmatprep.subr.bf16.mxu1 %v3018_v61  ;;  %v847_v53 = vadd.f32 %v846_v44, %v845_v36  ;;  %v1175_v61 = vld [vmem:[#allocation15 + $0xc8] sm:$0xff]  ;;  %v1060_v9 = vrot.slane %v1052_v46, %v3550_v39  ;;  %v1405_v44 = vld [vmem:[#allocation15 + $0x7f8] sm:$0xff] }
 0x1ec   :  { %v2802_v29 = vpack.c.bf16 %v1175_v61, %v3634_v49  ;;  %v1389_v61 = vld [vmem:[#allocation15 + $0x778] sm:$0xff] }
 0x1ee   :  { %3021 = vmatpush3.bf16.msra.mxu1 %v3020_v62  ;;  %v1384_v62 = vld [vmem:[#allocation15 + $0x750] sm:$0xff] }
 0x1ef   :  { %3023 = vmatprep.subr.bf16.mxu1 %v3022_v33 }
 0x1f2   :  { %3025 = vmatpush3.bf16.msra.mxu1 %v3024_v0  ;;  %v592_v0 = vld [vmem:[#allocation7 + $0x260] sm:$0xff] }
 0x1f3   :  { %3027 = vmatprep.subr.bf16.mxu1 %v3026_v7  ;;  %v593_v7 = vld [vmem:[#allocation7 + $0x268] sm:$0xff] }
 0x254   :  { %v394_v43 = vpop.f32.mrb[0].mxu1 }
 0x255   :  { %v395_v51 = vadd.f32 %v394_v43, %v321_v12  ;;  %v396_v52 = vpop.f32.mrb[1].mxu1  ;;  %v836_v12 = vadd.f32 %v835_v55, %v834_v42  ;;  %v1173_v42 = vld [vmem:[#allocation15 + $0xb8] sm:$0xff] }
 0x256   :  { %v397_v56 = vadd.f32 %v396_v52, %v325_v21  ;;  %v3618_v21 = vadd.f32 %v692_v47, %v691_v25  ;;  %v1154_v25 = vld [vmem:[#allocation15 + $0x20] sm:$0xff]  ;;  %v532_v47 = vld [vmem:[#allocation7 + $0x80] sm:$0xff]  ;;  %v2798_v55 = vpack.c.bf16 %v1173_v42, %v1172_v41  ;;  %v1387_v42 = vld [vmem:[#allocation15 + $0x768] sm:$0xff] }
 0x257   :  { %v399_v17 = vmax.f32 %v395_v51, 0.0  ;;  %v837_v31 = vrot.slane %v836_v12, 2  ;;  %v1401_v51 = vld [vmem:[#allocation15 + $0x7d8] sm:$0xff]  ;;  %v708_v60 = vadd.f32 %v552_v54, %v532_v47  ;;  %v1386_v41 = vld [vmem:[#allocation15 + $0x760] sm:$0xff] }
 0x258   :  { %v400_v3 = vmax.f32 %v397_v56, 0.0  ;;  %v967_v5 = vcombine.low %v3616_v63, %v3618_v21  ;;  %v1385_v63 = vld [vmem:[#allocation15 + $0x758] sm:$0xff]  ;;  %v3030_v11 = vpack.c.bf16 %v1401_v51, %v1400_v50  ;;  %v1158_v21 = vld [vmem:[#allocation15 + $0x40] sm:$0xff]  ;;  %v3036_v54 = vpack.c.bf16 %v1387_v42, %v1386_v41  ;;  %v575_v42 = vld [vmem:[#allocation7 + $0x1d8] sm:$0xff] }
 0x259   :  { %v838_v35 = vadd.f32 %v837_v31, %v836_v12  ;;  %v553_v12 = vld [vmem:[#allocation7 + $0x128] sm:$0xff]  ;;  %v709_v19 = vrot.slane %v708_v60, 4  ;;  %v1159_v31 = vld [vmem:[#allocation15 + $0x48] sm:$0xff]  ;;  %v3032_v33 = vpack.c.bf16 %v1385_v63, %v1384_v62 }
 0x25a   :  { %504 = vmatprep.mubr.f32.mxu0 %v400_v3  ;;  %v975_v1 = vrot.slane %v967_v5, %v3550_v39  ;;  %v982_v3 = vrot.slane %v968_v45, %v3550_v39  ;;  %v715_v20 = vadd.f32 %v553_v12, %v533_v57  ;;  %v3649_v51 = vld [vmem:[#allocation15 + $0x60] sm:$0xff]  ;;  %v3666_v12 = vld [vmem:[#allocation15 + $0x78] sm:$0xff] }
 0x25b   :  { %505 = vmatmul.mubr.f32.vlgmr.msra.gmra.mrb[2].mxu0 %v399_v17  ;;  %v839_v43 = vrot.slane %v838_v35, 1  ;;  %v555_v17 = vld [vmem:[#allocation7 + $0x138] sm:$0xff]  ;;  %v3647_v46 = vadd.f32 %v709_v19, %v708_v60  ;;  %v3689_v41 = vld [vmem:[#allocation15 + $0x918] sm:$0xff] }
 0x25c   :  { %2789 = vmatpush3.bf16.msra.mxu0 %v2788_v27  ;;  %1645 = vmatprep.mubr.f32.mxu0 %v1491_v15  ;;  %v1382_v27 = vld [vmem:[#allocation15 + $0x740] sm:$0xff]  ;;  %v1383_v15 = vld [vmem:[#allocation15 + $0x748] sm:$0xff]  ;;  %v729_v28 = vadd.f32 %v555_v17, %v535_v59  ;;  %v983_v30 = vcombine.low %v975_v1, %v982_v3  ;;  %v716_v36 = vrot.slane %v715_v20, 4  ;;  %v1388_v60 = vld [vmem:[#allocation15 + $0x770] sm:$0xff] }
 0x25d   :  { %2791 = vmatprep.subr.bf16.mxu0 %v2790_v16  ;;  %v2796_v16 = vpack.c.bf16 %v1155_v40, %v1154_v25  ;;  %v840_v52 = vadd.f32 %v839_v43, %v838_v35  ;;  %v3028_v56 = vpack.c.bf16 %v1383_v15, %v1382_v27  ;;  %v3641_v25 = vld [vmem:[#allocation15 + $0x50] sm:$0xff]  ;;  %v3034_v40 = vpack.c.bf16 %v1403_v14, %v1402_v22  ;;  %v3645_v15 = vld [vmem:[#allocation15 + $0xe0] sm:$0xff]  ;;  %v1439_v19 = vld [vmem:[#allocation15 + $0x908] sm:$0xff] }
 0x25e   :  { %v572_v35 = vld [vmem:[#allocation7 + $0x1c0] sm:$0xff]  ;;  %v730_v5 = vrot.slane %v729_v28, 4  ;;  %v2804_v27 = vpack.c.bf16 %v1159_v31, %v1158_v21  ;;  %v2808_v57 = vpack.c.bf16 %v3643_v26, %v3641_v25  ;;  %v2810_v63 = vpack.c.bf16 %v1179_v48, %v3645_v15  ;;  %v3671_v17 = vld [vmem:[#allocation15 + $0x900] sm:$0xff] }
 0x25f   :  { %v1053_v4 = vcombine.low %v840_v52, %v847_v53  ;;  %3029 = vmatpush3.bf16.msra.mxu1 %v3028_v56  ;;  %v1404_v43 = vld [vmem:[#allocation15 + $0x7f0] sm:$0xff]  ;;  %v848_v50 = vadd.f32 %v592_v0, %v572_v35  ;;  %v3651_v52 = vld [vmem:[#allocation15 + $0x68] sm:$0xff] }
 0x260   :  { %2793 = vmatpush3.bf16.msra.mxu0 %v2792_v32  ;;  %v1177_v32 = vld [vmem:[#allocation15 + $0xd8] sm:$0xff]  ;;  %3031 = vmatprep.subr.bf16.mxu1 %v3030_v11  ;;  %v3653_v53 = vld [vmem:[#allocation15 + $0xf0] sm:$0xff]  ;;  %v731_v56 = vadd.f32 %v730_v5, %v729_v28  ;;  %v3038_v59 = vpack.c.bf16 %v1405_v44, %v1404_v43  ;;  %v855_v11 = vadd.f32 %v593_v7, %v573_v6  ;;  %v594_v25 = vld [vmem:[#allocation7 + $0x270] sm:$0xff] }
 0x261   :  { %2795 = vmatprep.subr.bf16.mxu0 %v2794_v38  ;;  %v1067_v23 = vrot.slane %v1053_v4, %v3550_v39  ;;  %v723_v38 = vrot.slane %v722_v24, 4  ;;  %v2806_v47 = vpack.c.bf16 %v1177_v32, %v1176_v18  ;;  %v3662_v1 = vld [vmem:[#allocation15 + $0x70] sm:$0xff]  ;;  %v1454_v4 = vld [vmem:[#allocation15 + $0x980] sm:$0xff]  ;;  %v849_v14 = vrot.slane %v848_v50, 4  ;;  %v3681_v18 = vld [vmem:[#allocation15 + $0x288] sm:$0xff] }
 0x262   :  { %v732_v28 = vrot.slane %v731_v56, 2  ;;  %v2814_v31 = vpack.c.bf16 %v3658_v58, %v3653_v53  ;;  %v2816_v26 = vpack.c.bf16 %v3666_v12, %v3662_v1  ;;  %v1456_v35 = vld [vmem:[#allocation15 + $0x990] sm:$0xff]  ;;  %v856_v43 = vrot.slane %v855_v11, 4  ;;  %v1214_v7 = vld [vmem:[#allocation15 + $0x200] sm:$0xff] }
 0x263   :  { %v1068_v34 = vcombine.low %v1060_v9, %v1067_v23  ;;  %v724_v49 = vadd.f32 %v723_v38, %v722_v24  ;;  %3033 = vmatpush3.bf16.msra.mxu1 %v3032_v33  ;;  %v1455_v9 = vld [vmem:[#allocation15 + $0x988] sm:$0xff]  ;;  %v3673_v23 = vld [vmem:[#allocation15 + $0x280] sm:$0xff]  ;;  %v3687_v38 = vld [vmem:[#allocation15 + $0x910] sm:$0xff] }
 0x264   :  { %2797 = vmatpush3.bf16.msra.mxu0 %v2796_v16  ;;  %v717_v16 = vadd.f32 %v716_v36, %v715_v20  ;;  %3035 = vmatprep.subr.bf16.mxu1 %v3034_v40  ;;  %v3040_v20 = vpack.c.bf16 %v1389_v61, %v1388_v60  ;;  %v3074_v32 = vpack.c.bf16 %v1455_v9, %v1454_v4  ;;  %v574_v33 = vld [vmem:[#allocation7 + $0x1d0] sm:$0xff]  ;;  %v1457_v36 = vld [vmem:[#allocation15 + $0x998] sm:$0xff]  ;;  %v595_v0 = vld [vmem:[#allocation7 + $0x278] sm:$0xff] }
 0x265   :  { %2799 = vmatprep.subr.bf16.mxu0 %v2798_v55  ;;  %v1115_v45 = vrot.slane %v1068_v34, 7  ;;  %v725_v22 = vrot.slane %v724_v49, 2  ;;  %v3076_v34 = vpack.c.bf16 %v1439_v19, %v3671_v17  ;;  %v850_v40 = vadd.f32 %v849_v14, %v848_v50  ;;  %v1215_v50 = vld [vmem:[#allocation15 + $0x208] sm:$0xff]  ;;  %v1461_v14 = vld [vmem:[#allocation15 + $0x9b8] sm:$0xff] }
 0x266   :  { %v718_v21 = vrot.slane %v717_v16, 2  ;;  %v862_v48 = vadd.f32 %v594_v25, %v574_v33  ;;  %v2850_v6 = vpack.c.bf16 %v3681_v18, %v3673_v23  ;;  %v3080_v53 = vpack.c.bf16 %v3689_v41, %v3687_v38  ;;  %v1443_v60 = vld [vmem:[#allocation15 + $0x928] sm:$0xff] }
 0x267   :  { %v1116_v55 = vsel %vm1091_vm2, %v1115_v45, %v983_v30  ;;  %3037 = vmatpush3.bf16.msra.mxu1 %v3036_v54  ;;  %v726_v15 = vadd.f32 %v725_v22, %v724_v49  ;;  %v1233_v49 = vld [vmem:[#allocation15 + $0x298] sm:$0xff]  ;;  %v1458_v54 = vld [vmem:[#allocation15 + $0x9a0] sm:$0xff]  ;;  %v869_v58 = vadd.f32 %v595_v0, %v575_v42  ;;  %v1460_v22 = vld [vmem:[#allocation15 + $0x9b0] sm:$0xff] }
 0x268   :  { %2801 = vmatpush3.bf16.msra.mxu0 %v2800_v10  ;;  %v1117_v62 = vsel %vm1093_vm3, %v1115_v45, %v1116_v55  ;;  %v711_v10 = vrot.slane %v3647_v46, 2  ;;  %3039 = vmatprep.subr.bf16.mxu1 %v3038_v59  ;;  %v1459_v55 = vld [vmem:[#allocation15 + $0x9a8] sm:$0xff]  ;;  %v1442_v59 = vld [vmem:[#allocation15 + $0x920] sm:$0xff] }
 0x269   :  { %2803 = vmatprep.subr.bf16.mxu0 %v2802_v29  ;;  %v1118_v3 = vsel %vm1095_vm4, %v1115_v45, %v1117_v62  ;;  %v2812_v29 = vpack.c.bf16 %v3651_v52, %v3649_v51  ;;  %v3694_v51 = vld [vmem:[#allocation15 + $0x290] sm:$0xff]  ;;  %v3698_v52 = vrot.slane %v3573_v37, %v3550_v39  ;;  %v727_v62 = vrot.slane %v726_v15, 1  ;;  %v1235_v25 = vld [vmem:[#allocation15 + $0x2a8] sm:$0xff]  ;;  %v1462_v0 = vld [vmem:[#allocation15 + $0x9c0] sm:$0xff] }
 0x26a   :  { %v3669_v13 = vsel %vm1097_vm5, %v1115_v45, %v1118_v3  ;;  %v712_v5 = vadd.f32 %v711_v10, %v3647_v46  ;;  %v733_v45 = vadd.f32 %v732_v28, %v731_v56  ;;  %v3078_v46 = vpack.c.bf16 %v1457_v36, %v1456_v35  ;;  %v1217_v28 = vld [vmem:[#allocation15 + $0x218] sm:$0xff] }
 0x26b   :  { %v1527_v24 = vcombine.high %v3669_v13, %v3669_v13  ;;  %3041 = vmatpush3.bf16.msra.mxu1 %v3040_v20  ;;  %v870_v9 = vrot.slane %v869_v58, 4  ;;  %v2852_v10 = vpack.c.bf16 %v1215_v50, %v1214_v7  ;;  %v3082_v12 = vpack.c.bf16 %v1459_v55, %v1458_v54  ;;  %v1237_v7 = vld [vmem:[#allocation15 + $0x2b8] sm:$0xff]  ;;  %v1447_v50 = vld [vmem:[#allocation15 + $0x948] sm:$0xff]  ;;  %v1464_v55 = vld [vmem:[#allocation15 + $0x9d0] sm:$0xff] }
 0x26c   :  { %2805 = vmatpush3.bf16.msra.mxu0 %v2804_v27  ;;  %v719_v27 = vadd.f32 %v718_v21, %v717_v16  ;;  %3075 = vmatprep.subr.bf16.mxu1 %v3074_v32  ;;  %v857_v16 = vadd.f32 %v856_v43, %v855_v11  ;;  %v713_v37 = vrot.slane %v712_v5, 1  ;;  %v734_v1 = vrot.slane %v733_v45, 1 }
 0x26d   :  { %2807 = vmatprep.subr.bf16.mxu0 %v2806_v47  ;;  %v1541_v30 = vrot.slane %v1527_v24, %v3550_v39  ;;  %v851_v47 = vrot.slane %v850_v40, 2  ;;  %v2854_v11 = vpack.c.bf16 %v1233_v49, %v3694_v51  ;;  %v1508_v19 = vcombine.high %v3698_v52, %v3698_v52  ;;  %v1216_v24 = vld [vmem:[#allocation15 + $0x210] sm:$0xff] }
 0x26e   :  { %v720_v61 = vrot.slane %v719_v27, 1  ;;  %v3084_v21 = vpack.c.bf16 %v1443_v60, %v1442_v59  ;;  %v871_v20 = vadd.f32 %v870_v9, %v869_v58  ;;  %v728_v32 = vadd.f32 %v727_v62, %v726_v15  ;;  %v1220_v59 = vld [vmem:[#allocation15 + $0x230] sm:$0xff]  ;;  %v1221_v60 = vld [vmem:[#allocation15 + $0x238] sm:$0xff]  ;;  %v1239_v62 = vld [vmem:[#allocation15 + $0x2c8] sm:$0xff] }
 0x26f   :  { %v1543_v44 = vcombine.high %v1541_v30, %v1541_v30  ;;  %v852_v56 = vadd.f32 %v851_v47, %v850_v40  ;;  %v3086_v40 = vpack.c.bf16 %v1461_v14, %v1460_v22  ;;  %v2856_v42 = vpack.c.bf16 %v1217_v28, %v1216_v24  ;;  %v1219_v47 = vld [vmem:[#allocation15 + $0x228] sm:$0xff]  ;;  %v1222_v14 = vld [vmem:[#allocation15 + $0x240] sm:$0xff]  ;;  %v1241_v24 = vld [vmem:[#allocation15 + $0x2d8] sm:$0xff] }
 0x270   :  { %2809 = vmatpush3.bf16.msra.mxu0 %v2808_v57  ;;  %v863_v57 = vrot.slane %v862_v48, 4  ;;  %v721_v18 = vadd.f32 %v720_v61, %v719_v27  ;;  %v872_v38 = vrot.slane %v871_v20, 2  ;;  %v1238_v61 = vld [vmem:[#allocation15 + $0x2c0] sm:$0xff] }
 0x271   :  { %2811 = vmatprep.subr.bf16.mxu0 %v2810_v63  ;;  %2135 = vmatprep.mubr.f32.mxu1 %v1543_v44  ;;  %v858_v63 = vrot.slane %v857_v16, 2  ;;  %v853_v3 = vrot.slane %v852_v56, 1  ;;  %v1218_v44 = vld [vmem:[#allocation15 + $0x220] sm:$0xff]  ;;  %v2866_v22 = vpack.c.bf16 %v1239_v62, %v1238_v61  ;;  %v1279_v62 = vld [vmem:[#allocation15 + $0x408] sm:$0xff] }
 0x272   :  { %2136 = vmatmul.mubr.f32.vlgmr.msra.gmra.mrb[8].mxu1 %v1541_v30  ;;  %v864_v4 = vadd.f32 %v863_v57, %v862_v48  ;;  %v1444_v30 = vld [vmem:[#allocation15 + $0x930] sm:$0xff]  ;;  %v873_v15 = vadd.f32 %v872_v38, %v871_v20  ;;  %v2860_v54 = vpack.c.bf16 %v1219_v47, %v1218_v44  ;;  %v1225_v38 = vld [vmem:[#allocation15 + $0x258] sm:$0xff]  ;;  %v1278_v61 = vld [vmem:[#allocation15 + $0x400] sm:$0xff] }
 0x273   :  { %3077 = vmatpush3.bf16.msra.mxu1 %v3076_v34  ;;  %v859_v17 = vadd.f32 %v858_v63, %v857_v16  ;;  %v735_v34 = vadd.f32 %v734_v1, %v733_v45  ;;  %v854_v35 = vadd.f32 %v853_v3, %v852_v56  ;;  %v1236_v45 = vld [vmem:[#allocation15 + $0x2b0] sm:$0xff]  ;;  %v1465_v56 = vld [vmem:[#allocation15 + $0x9d8] sm:$0xff] }
 0x274   :  { %2813 = vmatpush3.bf16.msra.mxu0 %v2812_v29  ;;  %3079 = vmatprep.subr.bf16.mxu1 %v3078_v46  ;;  %v865_v23 = vrot.slane %v864_v4, 2  ;;  %v1234_v29 = vld [vmem:[#allocation15 + $0x2a0] sm:$0xff]  ;;  %v874_v46 = vrot.slane %v873_v15, 1  ;;  %v2862_v58 = vpack.c.bf16 %v1237_v7, %v1236_v45  ;;  %v3094_v9 = vpack.c.bf16 %v1465_v56, %v1464_v55  ;;  %v1240_v20 = vld [vmem:[#allocation15 + $0x2d0] sm:$0xff]  ;;  %v1229_v55 = vld [vmem:[#allocation15 + $0x278] sm:$0xff] }
 0x275   :  { %2815 = vmatprep.subr.bf16.mxu0 %v2814_v31  ;;  %v714_v31 = vadd.f32 %v713_v37, %v712_v5  ;;  %v860_v33 = vrot.slane %v859_v17, 1  ;;  %v1463_v5 = vld [vmem:[#allocation15 + $0x9c8] sm:$0xff]  ;;  %v2858_v43 = vpack.c.bf16 %v1235_v25, %v1234_v29  ;;  %v985_v16 = vcombine.low %v728_v32, %v735_v34  ;;  %v1450_v32 = vld [vmem:[#allocation15 + $0x960] sm:$0xff] }
 0x276   :  { %v866_v36 = vadd.f32 %v865_v23, %v864_v4  ;;  %v875_v57 = vadd.f32 %v874_v46, %v873_v15  ;;  %v1223_v23 = vld [vmem:[#allocation15 + $0x248] sm:$0xff]  ;;  %v1453_v15 = vld [vmem:[#allocation15 + $0x978] sm:$0xff]  ;;  %v1294_v56 = vld [vmem:[#allocation15 + $0x480] sm:$0xff] }
 0x277   :  { %3081 = vmatpush3.bf16.msra.mxu1 %v3080_v53  ;;  %v861_v41 = vadd.f32 %v860_v33, %v859_v17  ;;  %v3090_v53 = vpack.c.bf16 %v1463_v5, %v1462_v0  ;;  %v999_v1 = vrot.slane %v985_v16, %v3550_v39  ;;  %v1466_v17 = vld [vmem:[#allocation15 + $0x9e0] sm:$0xff]  ;;  %v1451_v33 = vld [vmem:[#allocation15 + $0x968] sm:$0xff]  ;;  %v2868_v25 = vpack.c.bf16 %v1223_v23, %v1222_v14  ;;  %v1300_v14 = vld [vmem:[#allocation15 + $0x4b0] sm:$0xff] }
 0x278   :  { %2817 = vmatpush3.bf16.msra.mxu0 %v2816_v26  ;;  %v1445_v26 = vld [vmem:[#allocation15 + $0x938] sm:$0xff]  ;;  %3083 = vmatprep.subr.bf16.mxu1 %v3082_v12  ;;  %v867_v27 = vrot.slane %v866_v36, 1  ;;  %v2864_v12 = vpack.c.bf16 %v1221_v60, %v1220_v59  ;;  %v3721_v60 = vrot.slane %v3588_v2, %v3550_v39  ;;  %v1299_v2 = vld [vmem:[#allocation15 + $0x4a8] sm:$0xff] }
 0x279   :  { %2851 = vmatprep.subr.bf16.mxu0 %v2850_v6  ;;  %v3088_v48 = vpack.c.bf16 %v1445_v26, %v1444_v30  ;;  %v984_v6 = vcombine.low %v714_v31, %v721_v18  ;;  %v1069_v49 = vcombine.low %v854_v35, %v861_v41  ;;  %v1468_v30 = vld [vmem:[#allocation15 + $0x9f0] sm:$0xff]  ;;  %v1469_v26 = vld [vmem:[#allocation15 + $0x9f8] sm:$0xff]  ;;  %v2870_v35 = vpack.c.bf16 %v1241_v24, %v1240_v20  ;;  %v1243_v41 = vld [vmem:[#allocation15 + $0x2e8] sm:$0xff] }
 0x27a   :  { %v868_v51 = vadd.f32 %v867_v27, %v866_v36  ;;  %v1224_v36 = vld [vmem:[#allocation15 + $0x250] sm:$0xff]  ;;  %v3102_v5 = vpack.c.bf16 %v1469_v26, %v1468_v30  ;;  %v1301_v23 = vld [vmem:[#allocation15 + $0x4b8] sm:$0xff] }
 0x27b   :  { %1646 = vmatmul.mubr.f32.vlgmr.msra.gmra.mrb[4].mxu0 %v3598_v8  ;;  %3085 = vmatpush3.bf16.msra.mxu1 %v3084_v21  ;;  %v1446_v8 = vld [vmem:[#allocation15 + $0x940] sm:$0xff]  ;;  %v992_v63 = vrot.slane %v984_v6, %v3550_v39  ;;  %v1077_v4 = vrot.slane %v1069_v49, %v3550_v39  ;;  %v1452_v27 = vld [vmem:[#allocation15 + $0x970] sm:$0xff]  ;;  %v2872_v44 = vpack.c.bf16 %v1225_v38, %v1224_v36  ;;  %v1227_v6 = vld [vmem:[#allocation15 + $0x268] sm:$0xff] }
 0x27c   :  { %2853 = vmatpush3.bf16.msra.mxu0 %v2852_v10  ;;  %1785 = vmatprep.mubr.f32.mxu0 %v1508_v19  ;;  %v3092_v37 = vpack.c.bf16 %v1447_v50, %v1446_v8  ;;  %v1070_v3 = vcombine.low %v868_v51, %v875_v57  ;;  %v1448_v10 = vld [vmem:[#allocation15 + $0x950] sm:$0xff]  ;;  %v1467_v19 = vld [vmem:[#allocation15 + $0x9e8] sm:$0xff]  ;;  %v1245_v50 = vld [vmem:[#allocation15 + $0x2f8] sm:$0xff]  ;;  %v3104_v51 = vpack.c.bf16 %v1453_v15, %v1452_v27 }
 0x27d   :  { %2855 = vmatprep.subr.bf16.mxu0 %v2854_v11  ;;  %3087 = vmatprep.subr.bf16.mxu1 %v3086_v40  ;;  %v1449_v11 = vld [vmem:[#allocation15 + $0x958] sm:$0xff]  ;;  %v1000_v29 = vcombine.low %v992_v63, %v999_v1  ;;  %v3098_v18 = vpack.c.bf16 %v1467_v19, %v1466_v17  ;;  %v1242_v40 = vld [vmem:[#allocation15 + $0x2e0] sm:$0xff]  ;;  %v1244_v8 = vld [vmem:[#allocation15 + $0x2f0] sm:$0xff]  ;;  %v2926_v24 = vpack.c.bf16 %v1301_v23, %v1300_v14 }
 0x27e   :  { %v1084_v21 = vrot.slane %v1070_v3, %v3550_v39  ;;  %v3096_v28 = vpack.c.bf16 %v1449_v11, %v1448_v10  ;;  %v2874_v45 = vpack.c.bf16 %v1243_v41, %v1242_v40  ;;  %v1295_v57 = vld [vmem:[#allocation15 + $0x488] sm:$0xff]  ;;  %v1296_v63 = vld [vmem:[#allocation15 + $0x490] sm:$0xff]  ;;  %v1297_v1 = vld [vmem:[#allocation15 + $0x498] sm:$0xff]  ;;  %v2916_v3 = vpack.c.bf16 %v1279_v62, %v1278_v61 }
 0x27f   :  { %3089 = vmatpush3.bf16.msra.mxu1 %v3088_v48  ;;  %v1226_v48 = vld [vmem:[#allocation15 + $0x260] sm:$0xff]  ;;  %v1280_v10 = vld [vmem:[#allocation15 + $0x410] sm:$0xff]  ;;  %v1281_v11 = vld [vmem:[#allocation15 + $0x418] sm:$0xff] }
 0x280   :  { %2857 = vmatpush3.bf16.msra.mxu0 %v2856_v42  ;;  %3091 = vmatprep.subr.bf16.mxu1 %v3090_v53  ;;  %v1085_v31 = vcombine.low %v1077_v4, %v1084_v21  ;;  %v3100_v42 = vpack.c.bf16 %v1451_v33, %v1450_v32  ;;  %v2876_v16 = vpack.c.bf16 %v1227_v6, %v1226_v48  ;;  %v1282_v21 = vld [vmem:[#allocation15 + $0x420] sm:$0xff]  ;;  %v1304_v30 = vld [vmem:[#allocation15 + $0x4d0] sm:$0xff]  ;;  %v1305_v26 = vld [vmem:[#allocation15 + $0x4d8] sm:$0xff] }
 0x281   :  { %2859 = vmatprep.subr.bf16.mxu0 %v2858_v43  ;;  %v2878_v53 = vpack.c.bf16 %v1245_v50, %v1244_v8  ;;  %v1525_v4 = vcombine.high %v3721_v60, %v3721_v60  ;;  %v2920_v17 = vpack.c.bf16 %v1281_v11, %v1280_v10  ;;  %v1286_v33 = vld [vmem:[#allocation15 + $0x440] sm:$0xff]  ;;  %v1288_v36 = vld [vmem:[#allocation15 + $0x450] sm:$0xff]  ;;  %v1289_v38 = vld [vmem:[#allocation15 + $0x458] sm:$0xff] }
 0x282   :  { %v1122_v34 = vrot.slane %v1085_v31, 7  ;;  %v1302_v31 = vld [vmem:[#allocation15 + $0x4c0] sm:$0xff]  ;;  %v1307_v41 = vld [vmem:[#allocation15 + $0x4e8] sm:$0xff]  ;;  %v1308_v15 = vld [vmem:[#allocation15 + $0x4f0] sm:$0xff] }
 0x283   :  { %3093 = vmatpush3.bf16.msra.mxu1 %v3092_v37  ;;  %v2914_v37 = vpack.c.bf16 %v1295_v57, %v1294_v56  ;;  %v1306_v40 = vld [vmem:[#allocation15 + $0x4e0] sm:$0xff]  ;;  %v1291_v27 = vld [vmem:[#allocation15 + $0x468] sm:$0xff]  ;;  %v1293_v48 = vld [vmem:[#allocation15 + $0x478] sm:$0xff] }
 0x284   :  { %2861 = vmatpush3.bf16.msra.mxu0 %v2860_v54  ;;  %3095 = vmatprep.subr.bf16.mxu1 %v3094_v9  ;;  %v1123_v0 = vsel %vm1091_vm2, %v1122_v34, %v1000_v29  ;;  %v1228_v54 = vld [vmem:[#allocation15 + $0x270] sm:$0xff]  ;;  %v2918_v9 = vpack.c.bf16 %v1297_v1, %v1296_v63  ;;  %v1285_v29 = vld [vmem:[#allocation15 + $0x438] sm:$0xff]  ;;  %v1358_v6 = vld [vmem:[#allocation15 + $0x680] sm:$0xff] }
 0x285   :  { %2863 = vmatprep.subr.bf16.mxu0 %v2862_v58  ;;  %v1124_v43 = vsel %vm1093_vm3, %v1122_v34, %v1123_v0  ;;  %v2880_v59 = vpack.c.bf16 %v1229_v55, %v1228_v54  ;;  %v2938_v0 = vpack.c.bf16 %v1307_v41, %v1306_v40  ;;  %v1359_v8 = vld [vmem:[#allocation15 + $0x688] sm:$0xff]  ;;  %v1361_v54 = vld [vmem:[#allocation15 + $0x698] sm:$0xff]  ;;  %v1346_v63 = vld [vmem:[#allocation15 + $0x620] sm:$0xff] }
 0x286   :  { %v1125_v47 = vsel %vm1095_vm4, %v1122_v34, %v1124_v43  ;;  %v1309_v43 = vld [vmem:[#allocation15 + $0x4f8] sm:$0xff]  ;;  %v1363_v61 = vld [vmem:[#allocation15 + $0x6a8] sm:$0xff]  ;;  %v1348_v11 = vld [vmem:[#allocation15 + $0x630] sm:$0xff] }
 0x287   :  { %3097 = vmatpush3.bf16.msra.mxu1 %v3096_v28  ;;  %v3714_v7 = vsel %vm1097_vm5, %v1122_v34, %v1125_v47  ;;  %v1284_v28 = vld [vmem:[#allocation15 + $0x430] sm:$0xff]  ;;  %v2942_v47 = vpack.c.bf16 %v1309_v43, %v1308_v15  ;;  %v1347_v1 = vld [vmem:[#allocation15 + $0x628] sm:$0xff]  ;;  %v1369_v23 = vld [vmem:[#allocation15 + $0x6d8] sm:$0xff] }
 0x288   :  { %2865 = vmatpush3.bf16.msra.mxu0 %v2864_v12  ;;  %3099 = vmatprep.subr.bf16.mxu1 %v3098_v18  ;;  %v1544_v46 = vcombine.high %v3714_v7, %v3714_v7  ;;  %v1298_v12 = vld [vmem:[#allocation15 + $0x4a0] sm:$0xff]  ;;  %v1303_v18 = vld [vmem:[#allocation15 + $0x4c8] sm:$0xff]  ;;  %v2928_v32 = vpack.c.bf16 %v1285_v29, %v1284_v28  ;;  %v1368_v14 = vld [vmem:[#allocation15 + $0x6d0] sm:$0xff] }
 0x289   :  { %2867 = vmatprep.subr.bf16.mxu0 %v2866_v22  ;;  %v2922_v19 = vpack.c.bf16 %v1299_v2, %v1298_v12  ;;  %v1283_v22 = vld [vmem:[#allocation15 + $0x428] sm:$0xff]  ;;  %v1349_v12 = vld [vmem:[#allocation15 + $0x638] sm:$0xff]  ;;  %v1366_v2 = vld [vmem:[#allocation15 + $0x6c0] sm:$0xff] }
 0x28a   :  { %v1558_v49 = vrot.slane %v1544_v46, %v3550_v39  ;;  %v2924_v20 = vpack.c.bf16 %v1283_v22, %v1282_v21  ;;  %v2978_v46 = vpack.c.bf16 %v1359_v8, %v1358_v6  ;;  %v1350_v21 = vld [vmem:[#allocation15 + $0x640] sm:$0xff]  ;;  %v1351_v22 = vld [vmem:[#allocation15 + $0x648] sm:$0xff]  ;;  %v1352_v28 = vld [vmem:[#allocation15 + $0x650] sm:$0xff] }
 0x28b   :  { %3101 = vmatpush3.bf16.msra.mxu1 %v3100_v42  ;;  %v2936_v42 = vpack.c.bf16 %v1289_v38, %v1288_v36  ;;  %v1353_v29 = vld [vmem:[#allocation15 + $0x658] sm:$0xff]  ;;  %v1356_v36 = vld [vmem:[#allocation15 + $0x670] sm:$0xff]  ;;  %v1422_v40 = vld [vmem:[#allocation15 + $0x880] sm:$0xff] }
 0x28c   :  { %2869 = vmatpush3.bf16.msra.mxu0 %v2868_v25  ;;  %3103 = vmatprep.subr.bf16.mxu1 %v3102_v5  ;;  %v1560_v58 = vcombine.high %v1558_v49, %v1558_v49  ;;  %v1287_v25 = vld [vmem:[#allocation15 + $0x448] sm:$0xff]  ;;  %v1290_v5 = vld [vmem:[#allocation15 + $0x460] sm:$0xff]  ;;  %v1357_v38 = vld [vmem:[#allocation15 + $0x678] sm:$0xff] }
 0x28d   :  { %2871 = vmatprep.subr.bf16.mxu0 %v2870_v35  ;;  %v2932_v34 = vpack.c.bf16 %v1287_v25, %v1286_v33  ;;  %v2934_v35 = vpack.c.bf16 %v1305_v26, %v1304_v30  ;;  %v1354_v33 = vld [vmem:[#allocation15 + $0x660] sm:$0xff]  ;;  %v1355_v25 = vld [vmem:[#allocation15 + $0x668] sm:$0xff]  ;;  %v1372_v30 = vld [vmem:[#allocation15 + $0x6f0] sm:$0xff] }
 0x28e   :  { %2275 = vmatprep.mubr.f32.mxu1 %v1560_v58  ;;  %v1344_v58 = vld [vmem:[#allocation15 + $0x610] sm:$0xff]  ;;  %v1373_v26 = vld [vmem:[#allocation15 + $0x6f8] sm:$0xff]  ;;  %v1423_v41 = vld [vmem:[#allocation15 + $0x888] sm:$0xff] }
 0x28f   :  { %3105 = vmatpush3.bf16.msra.mxu1 %v3104_v51  ;;  %v3728_v51 = vrot.slane %v3669_v13, %v3550_v39  ;;  %v1407_v15 = vld [vmem:[#allocation15 + $0x808] sm:$0xff]  ;;  %v1424_v43 = vld [vmem:[#allocation15 + $0x890] sm:$0xff]  ;;  %v1409_v8 = vld [vmem:[#allocation15 + $0x818] sm:$0xff] }
 0x290   :  { %2873 = vmatpush3.bf16.msra.mxu0 %v2872_v44  ;;  %v2940_v44 = vpack.c.bf16 %v1291_v27, %v1290_v5  ;;  %v3042_v5 = vpack.c.bf16 %v1423_v41, %v1422_v40  ;;  %v1406_v27 = vld [vmem:[#allocation15 + $0x800] sm:$0xff]  ;;  %v1408_v6 = vld [vmem:[#allocation15 + $0x810] sm:$0xff] }
 0x291   :  { %2875 = vmatprep.subr.bf16.mxu0 %v2874_v45  ;;  %v1292_v45 = vld [vmem:[#allocation15 + $0x470] sm:$0xff]  ;;  %v1542_v56 = vcombine.high %v3728_v51, %v3728_v51 }
 0x292   :  { %2276 = vmatmul.mubr.f32.vlgmr.msra.gmra.mrb[10].mxu1 %v1558_v49  ;;  %v2944_v50 = vpack.c.bf16 %v1293_v48, %v1292_v45  ;;  %v1343_v49 = vld [vmem:[#allocation15 + $0x608] sm:$0xff] }
 0x294   :  { %2877 = vmatpush3.bf16.msra.mxu0 %v2876_v16  ;;  %v1342_v16 = vld [vmem:[#allocation15 + $0x600] sm:$0xff] }
 0x295   :  { %2879 = vmatprep.subr.bf16.mxu0 %v2878_v53  ;;  %v1360_v53 = vld [vmem:[#allocation15 + $0x690] sm:$0xff]  ;;  %v2980_v55 = vpack.c.bf16 %v1343_v49, %v1342_v16  ;;  %v1410_v16 = vld [vmem:[#allocation15 + $0x820] sm:$0xff]  ;;  %v1411_v49 = vld [vmem:[#allocation15 + $0x828] sm:$0xff] }
 0x296   :  { %v2982_v57 = vpack.c.bf16 %v1361_v54, %v1360_v53  ;;  %v1428_v53 = vld [vmem:[#allocation15 + $0x8b0] sm:$0xff]  ;;  %v1429_v54 = vld [vmem:[#allocation15 + $0x8b8] sm:$0xff] }
 0x298   :  { %2881 = vmatpush3.bf16.msra.mxu0 %v2880_v59  ;;  %v1345_v59 = vld [vmem:[#allocation15 + $0x618] sm:$0xff] }
 0x299   :  { %2915 = vmatprep.subr.bf16.mxu0 %v2914_v37  ;;  %v1362_v37 = vld [vmem:[#allocation15 + $0x6a0] sm:$0xff]  ;;  %v2984_v13 = vpack.c.bf16 %v1345_v59, %v1344_v58  ;;  %v1413_v58 = vld [vmem:[#allocation15 + $0x838] sm:$0xff] }
 0x29a   :  { %v2986_v62 = vpack.c.bf16 %v1363_v61, %v1362_v37  ;;  %v1430_v59 = vld [vmem:[#allocation15 + $0x8c0] sm:$0xff]  ;;  %v1431_v37 = vld [vmem:[#allocation15 + $0x8c8] sm:$0xff] }
 0x29b   :  { %1786 = vmatmul.mubr.f32.vlgmr.msra.gmra.mrb[6].mxu0 %v3698_v52  ;;  %v2930_v52 = vpack.c.bf16 %v1303_v18, %v1302_v31  ;;  %v1370_v31 = vld [vmem:[#allocation15 + $0x6e0] sm:$0xff]  ;;  %v1371_v18 = vld [vmem:[#allocation15 + $0x6e8] sm:$0xff] }
 0x29c   :  { %2917 = vmatpush3.bf16.msra.mxu0 %v2916_v3  ;;  %1925 = vmatprep.mubr.f32.mxu0 %v1525_v4  ;;  %v1364_v3 = vld [vmem:[#allocation15 + $0x6b0] sm:$0xff]  ;;  %v1365_v4 = vld [vmem:[#allocation15 + $0x6b8] sm:$0xff] }
 0x29d   :  { %2919 = vmatprep.subr.bf16.mxu0 %v2918_v9  ;;  %v2988_v9 = vpack.c.bf16 %v1347_v1, %v1346_v63  ;;  %v2990_v10 = vpack.c.bf16 %v1365_v4, %v1364_v3  ;;  %v1432_v63 = vld [vmem:[#allocation15 + $0x8d0] sm:$0xff]  ;;  %v1433_v1 = vld [vmem:[#allocation15 + $0x8d8] sm:$0xff]  ;;  %v2407_v3 = vpop.f32.mrb[2].mxu1 }
 0x29e   :  { %v2408_v4 = vpop.f32.mrb[3].mxu1 }
 0x2a0   :  { %2921 = vmatpush3.bf16.msra.mxu0 %v2920_v17  ;;  %v1367_v17 = vld [vmem:[#allocation15 + $0x6c8] sm:$0xff] }
 0x2a1   :  { %2923 = vmatprep.subr.bf16.mxu0 %v2922_v19  ;;  %v2992_v19 = vpack.c.bf16 %v1349_v12, %v1348_v11  ;;  %v3062_v11 = vpack.c.bf16 %v1433_v1, %v1432_v63  ;;  %v1416_v12 = vld [vmem:[#allocation15 + $0x850] sm:$0xff] }
 0x2a4   :  { %2925 = vmatpush3.bf16.msra.mxu0 %v2924_v20  ;;  %v2996_v20 = vpack.c.bf16 %v1351_v22, %v1350_v21  ;;  %v1418_v22 = vld [vmem:[#allocation15 + $0x860] sm:$0xff] }
 0x2a5   :  { %2927 = vmatprep.subr.bf16.mxu0 %v2926_v24  ;;  %v2998_v24 = vpack.c.bf16 %v1369_v23, %v1368_v14  ;;  %v1419_v14 = vld [vmem:[#allocation15 + $0x868] sm:$0xff]  ;;  %v1436_v23 = vld [vmem:[#allocation15 + $0x8f0] sm:$0xff] }
 0x2a8   :  { %2929 = vmatpush3.bf16.msra.mxu0 %v2928_v32  ;;  %v3000_v32 = vpack.c.bf16 %v1353_v29, %v1352_v28  ;;  %v1420_v29 = vld [vmem:[#allocation15 + $0x870] sm:$0xff] }
 0x2a9   :  { %2931 = vmatprep.subr.bf16.mxu0 %v2930_v52  ;;  %v3002_v52 = vpack.c.bf16 %v1371_v18, %v1370_v31  ;;  %v1421_v31 = vld [vmem:[#allocation15 + $0x878] sm:$0xff] }
 0x2aa   :  { %v3072_v18 = vpack.c.bf16 %v1421_v31, %v1420_v29 }
 0x2ac   :  { %2933 = vmatpush3.bf16.msra.mxu0 %v2932_v34  ;;  %v3004_v34 = vpack.c.bf16 %v1355_v25, %v1354_v33 }
 0x2ad   :  { %2935 = vmatprep.subr.bf16.mxu0 %v2934_v35  ;;  %v3006_v35 = vpack.c.bf16 %v1373_v26, %v1372_v30 }
 0x2b0   :  { %2937 = vmatpush3.bf16.msra.mxu0 %v2936_v42  ;;  %v3008_v42 = vpack.c.bf16 %v1357_v38, %v1356_v36 }
 0x2b1   :  { %2939 = vmatprep.subr.bf16.mxu0 %v2938_v0  ;;  %v3735_v0 = vrot.slane %v3714_v7, %v3550_v39  ;;  %v3048_v39 = vpack.c.bf16 %v1409_v8, %v1408_v6 }
 0x2b3   :  { %v1559_v45 = vcombine.high %v3735_v0, %v3735_v0 }
 0x2b4   :  { %2941 = vmatpush3.bf16.msra.mxu0 %v2940_v44  ;;  %v1425_v44 = vld [vmem:[#allocation15 + $0x898] sm:$0xff] }
 0x2b5   :  { %2943 = vmatprep.subr.bf16.mxu0 %v2942_v47  ;;  %v3044_v47 = vpack.c.bf16 %v1407_v15, %v1406_v27  ;;  %v3046_v48 = vpack.c.bf16 %v1425_v44, %v1424_v43 }
 0x2b8   :  { %2945 = vmatpush3.bf16.msra.mxu0 %v2944_v50  ;;  %v1426_v50 = vld [vmem:[#allocation15 + $0x8a0] sm:$0xff] }
 0x2b9   :  { %2979 = vmatprep.subr.bf16.mxu0 %v2978_v46  ;;  %v1427_v46 = vld [vmem:[#allocation15 + $0x8a8] sm:$0xff] }
 0x2ba   :  { %v3050_v7 = vpack.c.bf16 %v1427_v46, %v1426_v50 }
 0x2bb   :  { %1926 = vmatmul.mubr.f32.vlgmr.msra.gmra.mrb[8].mxu0 %v3721_v60  ;;  %v2994_v60 = vpack.c.bf16 %v1367_v17, %v1366_v2  ;;  %v1417_v2 = vld [vmem:[#allocation15 + $0x858] sm:$0xff]  ;;  %v1434_v17 = vld [vmem:[#allocation15 + $0x8e0] sm:$0xff] }
 0x2bc   :  { %2981 = vmatpush3.bf16.msra.mxu0 %v2980_v55  ;;  %2065 = vmatprep.mubr.f32.mxu0 %v1542_v56  ;;  %v3052_v55 = vpack.c.bf16 %v1411_v49, %v1410_v16  ;;  %v3054_v56 = vpack.c.bf16 %v1429_v54, %v1428_v53 }
 0x2bd   :  { %2983 = vmatprep.subr.bf16.mxu0 %v2982_v57  ;;  %v1412_v57 = vld [vmem:[#allocation15 + $0x830] sm:$0xff] }
 0x2be   :  { %v3056_v61 = vpack.c.bf16 %v1413_v58, %v1412_v57 }
 0x2c0   :  { %2985 = vmatpush3.bf16.msra.mxu0 %v2984_v13  ;;  %v1414_v13 = vld [vmem:[#allocation15 + $0x840] sm:$0xff] }
 0x2c1   :  { %2987 = vmatprep.subr.bf16.mxu0 %v2986_v62  ;;  %v1415_v62 = vld [vmem:[#allocation15 + $0x848] sm:$0xff] }
 0x2c4   :  { %2989 = vmatpush3.bf16.msra.mxu0 %v2988_v9  ;;  %v3060_v9 = vpack.c.bf16 %v1415_v62, %v1414_v13 }
 0x2c5   :  { %2991 = vmatprep.subr.bf16.mxu0 %v2990_v10  ;;  %v2409_v10 = vadd.f32 %v2408_v4, %v2407_v3 }
 0x2c8   :  { %2993 = vmatpush3.bf16.msra.mxu0 %v2992_v19  ;;  %v1435_v19 = vld [vmem:[#allocation15 + $0x8e8] sm:$0xff] }
 0x2c9   :  { %2995 = vmatprep.subr.bf16.mxu0 %v2994_v60  ;;  %v3064_v60 = vpack.c.bf16 %v1417_v2, %v1416_v12  ;;  %v3066_v21 = vpack.c.bf16 %v1435_v19, %v1434_v17 }
 0x2cc   :  { %2997 = vmatpush3.bf16.msra.mxu0 %v2996_v20  ;;  %v1437_v20 = vld [vmem:[#allocation15 + $0x8f8] sm:$0xff] }
 0x2cd   :  { %2999 = vmatprep.subr.bf16.mxu0 %v2998_v24  ;;  %v3068_v24 = vpack.c.bf16 %v1419_v14, %v1418_v22  ;;  %v3070_v28 = vpack.c.bf16 %v1437_v20, %v1436_v23 }
 0x2d0   :  { %3001 = vmatpush3.bf16.msra.mxu0 %v3000_v32  ;;  %v2477_v32 = vpop.f32.mrb[4].mxu1 }
 0x2d1   :  { %3003 = vmatprep.subr.bf16.mxu0 %v3002_v52  ;;  %v2478_v52 = vpop.f32.mrb[5].mxu1 }
 0x2d2   :  { %v2479_v33 = vadd.f32 %v2478_v52, %v2477_v32  ;;  %v2547_v25 = vpop.f32.mrb[6].mxu1 }
 0x2d3   :  { %v2548_v30 = vpop.f32.mrb[7].mxu1 }
 0x2d4   :  { %3005 = vmatpush3.bf16.msra.mxu0 %v3004_v34  ;;  %v2549_v26 = vadd.f32 %v2548_v30, %v2547_v25 }
 0x2d5   :  { %3007 = vmatprep.subr.bf16.mxu0 %v3006_v35  ;;  %v2304_v35 = vld [vmem:[#allocation18] ss:$0 sm:$0xff] }
 0x2d8   :  { %3009 = vmatpush3.bf16.msra.mxu0 %v3008_v42 }
 0x2d9   :  { %3043 = vmatprep.subr.bf16.mxu0 %v3042_v5 }
 0x2db   :  { %2066 = vmatmul.mubr.f32.vlgmr.msra.gmra.mrb[10].mxu0 %v3728_v51  ;;  %v3058_v51 = vpack.c.bf16 %v1431_v37, %v1430_v59 }
 0x2dc   :  { %3045 = vmatpush3.bf16.msra.mxu0 %v3044_v47  ;;  %2205 = vmatprep.mubr.f32.mxu0 %v1559_v45 }
 0x2dd   :  { %3047 = vmatprep.subr.bf16.mxu0 %v3046_v48 }
 0x2e0   :  { %3049 = vmatpush3.bf16.msra.mxu0 %v3048_v39 }
 0x2e1   :  { %3051 = vmatprep.subr.bf16.mxu0 %v3050_v7 }
 0x2e4   :  { %3053 = vmatpush3.bf16.msra.mxu0 %v3052_v55 }
 0x2e5   :  { %3055 = vmatprep.subr.bf16.mxu0 %v3054_v56 }
 0x2e8   :  { %3057 = vmatpush3.bf16.msra.mxu0 %v3056_v61 }
 0x2e9   :  { %3059 = vmatprep.subr.bf16.mxu0 %v3058_v51 }
 0x2ec   :  { %3061 = vmatpush3.bf16.msra.mxu0 %v3060_v9 }
 0x2ed   :  { %3063 = vmatprep.subr.bf16.mxu0 %v3062_v11 }
 0x2f0   :  { %3065 = vmatpush3.bf16.msra.mxu0 %v3064_v60 }
 0x2f1   :  { %3067 = vmatprep.subr.bf16.mxu0 %v3066_v21 }
 0x2f4   :  { %3069 = vmatpush3.bf16.msra.mxu0 %v3068_v24 }
 0x2f5   :  { %3071 = vmatprep.subr.bf16.mxu0 %v3070_v28 }
 0x2f8   :  { %3073 = vmatpush3.bf16.msra.mxu0 %v3072_v18 }
 0x2fb   :  { %2206 = vmatmul.mubr.f32.vlgmr.msra.gmra.mrb[12].mxu0 %v3735_v0 }
 0x32e   :  { %v2337_v34 = vpop.f32.mrb[2].mxu0 }
 0x32f   :  { %v2338_v36 = vpop.f32.mrb[3].mxu0 }
 0x330   :  { %v2339_v38 = vadd.f32 %v2338_v36, %v2337_v34 }
 0x332   :  { %v507_v40 = vadd.f32 %v2339_v38, %v2304_v35 }
 0x334   :  { %510 = vst [vmem:[#allocation3] sm:$0x3] %v507_v40 }
 0x33b   :  { %v1470_v44 = vld [vmem:[#allocation3] sm:$0x3] }
 0x345   :  { %v2617_v41 = vpop.f32.mrb[8].mxu1 }
 0x346   :  { %v2618_v42 = vpop.f32.mrb[9].mxu1 }
 0x347   :  { %v2619_v5 = vadd.f32 %v2618_v42, %v2617_v41 }
 0x34e   :  { %v2372_v27 = vpop.f32.mrb[4].mxu0 }
 0x34f   :  { %v2373_v15 = vpop.f32.mrb[5].mxu0 }
 0x350   :  { %v2374_v43 = vadd.f32 %v2373_v15, %v2372_v27 }
 0x352   :  { %v1648_v0 = vadd.f32 %v2374_v43, %v1470_v44 }
 0x354   :  { %v1718_v47 = vadd.f32 %v2409_v10, %v1648_v0 }
 0x365   :  { %v2687_v45 = vpop.f32.mrb[10].mxu1 }
 0x366   :  { %v2688_v48 = vpop.f32.mrb[11].mxu1 }
 0x367   :  { %v2689_v6 = vadd.f32 %v2688_v48, %v2687_v45 }
 0x36e   :  { %v2442_v8 = vpop.f32.mrb[6].mxu0 }
 0x36f   :  { %v2443_v50 = vpop.f32.mrb[7].mxu0 }
 0x370   :  { %v2444_v46 = vadd.f32 %v2443_v50, %v2442_v8 }
 0x372   :  { %v1788_v39 = vadd.f32 %v2444_v46, %v1718_v47 }
 0x374   :  { %v1858_v7 = vadd.f32 %v2479_v33, %v1788_v39 }
 0x38e   :  { %v2512_v16 = vpop.f32.mrb[8].mxu0 }
 0x38f   :  { %v2513_v49 = vpop.f32.mrb[9].mxu0 }
 0x390   :  { %v2514_v53 = vadd.f32 %v2513_v49, %v2512_v16 }
 0x392   :  { %v1928_v54 = vadd.f32 %v2514_v53, %v1858_v7 }
 0x394   :  { %v1998_v55 = vadd.f32 %v2549_v26, %v1928_v54 }
 0x3ae   :  { %v2582_v56 = vpop.f32.mrb[10].mxu0 }
 0x3af   :  { %v2583_v57 = vpop.f32.mrb[11].mxu0 }
 0x3b0   :  { %v2584_v58 = vadd.f32 %v2583_v57, %v2582_v56 }
 0x3b2   :  { %v2068_v59 = vadd.f32 %v2584_v58, %v1998_v55 }
 0x3b4   :  { %v2138_v37 = vadd.f32 %v2619_v5, %v2068_v59 }
 0x3ce   :  { %v2652_v61 = vpop.f32.mrb[12].mxu0 }
 0x3cf   :  { %v2653_v51 = vpop.f32.mrb[13].mxu0 }
 0x3d0   :  { %v2654_v13 = vadd.f32 %v2653_v51, %v2652_v61 }
 0x3d2   :  { %v2208_v62 = vadd.f32 %v2654_v13, %v2138_v37 }
 0x3d4   :  { %v2278_v63 = vadd.f32 %v2689_v6, %v2208_v62 }
 0x3d6   :  { %2281 = vst [vmem:[#allocation19] sm:$0x3] %v2278_v63 }
 0x3d7   :  { %3334 = shalt.err (!%p3331_p6)
}
 0x3d8   :  { %s3335_s27 = scalar_lea.hbm %s3762_s9, 32 }
 0x3d9   :  { %p3336_p7 = scmp.ne.s32.totalorder %s3762_s9, %s3335_s27  ;;  %p3339_p8 = scmp.lt.u32.totalorder %s3335_s27, %s3762_s9 }
 0x3db   :  { %p3341_p9 = pnand %p3339_p8, %p3336_p7 }
 0x3dd   :  { %3344 = shalt.err (!%p3341_p9)
}
 0x3de   :  { %2291 = dma.vmem_to_hbm [thread:$0]  %s2289_s14, 32, %s3762_s9, [#allocation6]  }
 0x3df   :  { %3355 = dma.done.wait [#allocation6], 32  }
 0x3e0   :  { %3356 = vsyncadd [#allocation6], 4294967264 }
 0x3e1   :  { %2295 = vsyncpa [#allocation5], 1 }
 0x3e2   :  { %2296 = vsyncpa [#allocation8], 1 }
 0x3e3   :  { %2297 = vsyncpa [#allocation11], 1 }
 0x3e4   :  { %2298 = vsyncpa [#allocation14], 1 }
 0x3e5   :  { %2299 = vsyncpa [#allocation17], 1 }
 0x3e6   :  { %2300 = vsyncpa [#allocation6], 1 }

</bundles_post_ra>
